<compile_context>
chip_gen: v7x
topology: tpu7x:2x2x1
jax: 0.10.0
libtpu: 0.0.40
codegen_flags: <defaults>
</compile_context>

<pallas_src>
import functools

import jax
import jax.numpy as jnp
from jax.experimental import pallas as pl
from jax.experimental.pallas import tpu as pltpu


def _round_up(x, m):
    return (x + m - 1) // m * m


# --------------------------------------------------------------------------- #
# Kernel
# --------------------------------------------------------------------------- #
def _lstm_scan_kernel(xw_ref, whh_hbm, hfinal_ref, whh_vmem, h_scr, c_scr, sem,
                      *, t_chunk, rem, n_full, h_pad, unroll):
    """One grid step = one chunk of LSTM timesteps for one batch block.

    xw_ref   : (t_chunk, B_blk, 4*H_pad) bf16  precomputed x@W_ih^T + b, gates [i,f,o,g]
    whh_hbm  : (H_pad, 4*H_pad) bf16 in HBM (ANY); copied once into whh_vmem
    hfinal_ref: (B_blk, H_pad) f32             final hidden state (last time chunk)
    whh_vmem : resident W_hh^T scratch (bf16)
    h_scr, c_scr: (B_blk, H_pad) f32           recurrent state carried across chunks
    """
    H = h_pad
    t_idx = pl.program_id(1)

    @pl.when(t_idx == 0)
    def _():
        # Load W_hh once per batch block (cheap, and correct under megacore
        # sharding of the batch axis); reset the recurrent state.
        cp = pltpu.make_async_copy(whh_hbm, whh_vmem, sem)
        cp.start()
        h_scr[...] = jnp.zeros_like(h_scr)
        c_scr[...] = jnp.zeros_like(c_scr)
        cp.wait()

    def step_body(t, carry):
        h, c = carry
        # bf16 stream upcast + bf16 MXU matmul with f32 accumulation.
        gates = xw_ref[t].astype(jnp.float32) + jnp.dot(
            h.astype(jnp.bfloat16), whh_vmem[...],
            preferred_element_type=jnp.float32)
        # gate layout [i | f | o | g]; each slot is H_pad lanes -> aligned views.
        sig = jax.nn.sigmoid(gates[:, 0:3 * H])
        g_g = jnp.tanh(gates[:, 3 * H:4 * H])
        i_g = sig[:, 0 * H:1 * H]
        f_g = sig[:, 1 * H:2 * H]
        o_g = sig[:, 2 * H:3 * H]
        c = f_g * c + i_g * g_g
        h = o_g * jnp.tanh(c)
        return h, c

    def run(n_steps):
        h, c = jax.lax.fori_loop(0, n_steps, step_body,
                                 (h_scr[...], c_scr[...]),
                                 unroll=min(unroll, n_steps))
        h_scr[...] = h
        c_scr[...] = c

    if rem == 0:
        run(t_chunk)
    else:
        # Statically-sized tail chunk: no dead recurrence steps, no S padding.
        @pl.when(t_idx < n_full)
        def _():
            run(t_chunk)

        @pl.when(t_idx == n_full)
        def _():
            run(rem)

    @pl.when(t_idx == pl.num_programs(1) - 1)
    def _():
        hfinal_ref[...] = h_scr[...]


# --------------------------------------------------------------------------- #
# One-time parameter repacking (gate order, padding, bf16 MXU operand)
# --------------------------------------------------------------------------- #
def pack_params(params):
    H = int(params["w_hh"].shape[1])
    E = int(params["w_ih"].shape[1])
    H_pad = _round_up(H, 128)
    perm = jnp.array([0, 1, 3, 2])  # torch [i, f, g, o] -> kernel [i, f, o, g]

    def pack_gate_rows(w):
        # (4H, ...) -> (4*H_pad, ...): permute gate blocks, zero-pad each to H_pad.
        w4 = w.reshape((4, H) + w.shape[1:])[perm]
        pad = [(0, 0), (0, H_pad - H)] + [(0, 0)] * (w.ndim - 1)
        return jnp.pad(w4, pad).reshape((4 * H_pad,) + w.shape[1:])

    w_ih_p = pack_gate_rows(params["w_ih"].astype(jnp.float32))                     # (4*H_pad, E)
    bias_p = pack_gate_rows((params["b_ih"] + params["b_hh"]).astype(jnp.float32))  # (4*H_pad,)

    whh_t = params["w_hh"].astype(jnp.float32).T                                    # (H, 4H)
    whh4 = whh_t.reshape(H, 4, H)[:, perm, :]
    whh4 = jnp.pad(whh4, ((0, H_pad - H), (0, 0), (0, H_pad - H)))
    whh_p = whh4.reshape(H_pad, 4 * H_pad).astype(jnp.bfloat16)                     # MXU operand

    return dict(
        embedding=params["embedding"].astype(jnp.float32),
        w_ih_p=w_ih_p, bias_p=bias_p, whh_p=whh_p,
        w1=params["w1"].astype(jnp.float32), b1=params["b1"].astype(jnp.float32),
        w2=params["w2"].astype(jnp.float32), b2=params["b2"].astype(jnp.float32),
        H=H, H_pad=H_pad, E=E,
    )


# --------------------------------------------------------------------------- #
# Forward pass
# --------------------------------------------------------------------------- #
def discriminator_forward(tokens, packed):
    """tokens: (B, S) int32 -> logits (B,) float32 (matches PyTorch forward)."""
    B, S = tokens.shape
    H, H_pad = packed["H"], packed["H_pad"]

    B_pad = _round_up(B, 16)                 # full bf16 sublane group
    # v7x megacore: split the batch across two TensorCores when it is big enough.
    n_b = 2 if (B_pad >= 256 and B_pad % 32 == 0) else 1
    B_blk = B_pad // n_b

    # --- glue (plain JAX): time-major gather + hoisted input projection -------
    # TODO(synk): on v5e (HBM-bound), streaming bf16 embeddings and fusing the
    # input projection into the kernel would cut HBM bytes further (4H/E ratio).
    x_tm = jnp.take(packed["embedding"], tokens.T, axis=0)               # (S, B, E)
    if B_pad != B:
        x_tm = jnp.pad(x_tm, ((0, 0), (0, B_pad - B), (0, 0)))           # small, E-wide
    # One large MXU-friendly matmul; gate order / hidden padding already baked
    # into w_ih_p / bias_p so no per-call permute/pad of the (S,B,4H) tensor.
    xw = jnp.einsum("sbe,fe->sbf", x_tm, packed["w_ih_p"]) + packed["bias_p"]
    xw = xw.astype(jnp.bfloat16)                                          # (S, B_pad, 4*H_pad)

    # --- VMEM-budget-driven time chunking --------------------------------------
    BUDGET = 40 * 1024 * 1024                 # plan target; fits v7x's 64 MiB VMEM
    fixed = (H_pad * 4 * H_pad * 2            # resident W_hh (bf16, single copy)
             + 2 * B_blk * H_pad * 4          # h, c state (f32)
             + 2 * B_blk * H_pad * 4)         # double-buffered output block
    per_t = 2 * B_blk * 4 * H_pad * 2         # double-buffered bf16 xw rows / timestep
    t_max = max(1, (BUDGET - fixed) // per_t)
    T_chunk = int(min(S, t_max, 512))
    n_full, rem = divmod(S, T_chunk)
    n_chunks = n_full + (1 if rem else 0)
    unroll = T_chunk if T_chunk <= 8 else 8   # LLO scheduling visibility

    kernel = functools.partial(_lstm_scan_kernel, t_chunk=T_chunk, rem=rem,
                               n_full=n_full, h_pad=H_pad, unroll=unroll)

    h_final = pl.pallas_call(
        kernel,
        out_shape=jax.ShapeDtypeStruct((B_pad, H_pad), jnp.float32),
        grid_spec=pltpu.PrefetchScalarGridSpec(
            num_scalar_prefetch=0,
            grid=(n_b, n_chunks),
            in_specs=[
                pl.BlockSpec((T_chunk, B_blk, 4 * H_pad), lambda b, t: (t, b, 0)),
                pl.BlockSpec(memory_space=pl.ANY),   # W_hh stays put; copied once
            ],
            out_specs=pl.BlockSpec((B_blk, H_pad), lambda b, t: (b, 0)),
            scratch_shapes=[
                pltpu.VMEM((H_pad, 4 * H_pad), jnp.bfloat16),   # resident W_hh
                pltpu.VMEM((B_blk, H_pad), jnp.float32),        # h state
                pltpu.VMEM((B_blk, H_pad), jnp.float32),        # c state
                pltpu.SemaphoreType.DMA,                        # weight-copy sem
            ],
        ),
        compiler_params=pltpu.CompilerParams(
            dimension_semantics=("parallel", "arbitrary"),
            vmem_limit_bytes=48 * 1024 * 1024,
        ),
    )(xw, packed["whh_p"])

    h = h_final[:B, :H]

    # --- classifier head in plain JAX (used once; kept out of recurrent VMEM) --
    # TODO(synk): Dropout is identity at inference; no stochastic mask applied.
    z = jnp.maximum(h @ packed["w1"].T + packed["b1"], 0.0)
    logits = z @ packed["w2"].T + packed["b2"]
    return logits[:, 0]


# --------------------------------------------------------------------------- #
# Pure-JAX reference + params
# --------------------------------------------------------------------------- #
def _reference_forward(tokens, params):
    """Pure-JAX f32 reference (mirrors torch LSTM + classifier)."""
    emb = jnp.take(params["embedding"], tokens, axis=0)      # (B, S, E)
    B, S, _ = emb.shape
    H = params["w_hh"].shape[1]
    h = jnp.zeros((B, H), jnp.float32)
    c = jnp.zeros((B, H), jnp.float32)
    b = params["b_ih"] + params["b_hh"]
    for t in range(S):
        g = emb[:, t, :] @ params["w_ih"].T + h @ params["w_hh"].T + b
        i_g = jax.nn.sigmoid(g[:, 0 * H:1 * H])
        f_g = jax.nn.sigmoid(g[:, 1 * H:2 * H])
        g_g = jnp.tanh(g[:, 2 * H:3 * H])
        o_g = jax.nn.sigmoid(g[:, 3 * H:4 * H])
        c = f_g * c + i_g * g_g
        h = o_g * jnp.tanh(c)
    z = jnp.maximum(h @ params["w1"].T + params["b1"], 0.0)
    return (z @ params["w2"].T + params["b2"])[:, 0]


def init_params(key, vocab_size, embedding_dim, hidden_dim):
    ks = jax.random.split(key, 9)
    s_lstm = 1.0 / jnp.sqrt(hidden_dim)
    s_lin = 1.0 / jnp.sqrt(hidden_dim)
    return {
        "embedding": jax.random.normal(ks[0], (vocab_size, embedding_dim), jnp.float32),
        "w_ih": jax.random.uniform(ks[1], (4 * hidden_dim, embedding_dim), jnp.float32, -s_lstm, s_lstm),
        "w_hh": jax.random.uniform(ks[2], (4 * hidden_dim, hidden_dim), jnp.float32, -s_lstm, s_lstm),
        "b_ih": jax.random.uniform(ks[3], (4 * hidden_dim,), jnp.float32, -s_lstm, s_lstm),
        "b_hh": jax.random.uniform(ks[4], (4 * hidden_dim,), jnp.float32, -s_lstm, s_lstm),
        "w1": jax.random.uniform(ks[5], (hidden_dim, hidden_dim), jnp.float32, -s_lin, s_lin),
        "b1": jax.random.uniform(ks[6], (hidden_dim,), jnp.float32, -s_lin, s_lin),
        "w2": jax.random.uniform(ks[7], (1, hidden_dim), jnp.float32, -s_lin, s_lin),
        "b2": jax.random.uniform(ks[8], (1,), jnp.float32, -s_lin, s_lin),
    }


if __name__ == "__main__":
    VOCAB, EMB, HID = 50, 16, 32
    BATCH, SEQ = 2, 8

    key = jax.random.PRNGKey(0)
    k_params, k_tok = jax.random.split(key)
    params = init_params(k_params, VOCAB, EMB, HID)
    tokens = jax.random.randint(k_tok, (BATCH, SEQ), 0, VOCAB, dtype=jnp.int32)

    packed = pack_params(params)            # one-time weight repack
    logits = discriminator_forward(tokens, packed)
    jax.block_until_ready(logits)

    ref = _reference_forward(tokens, params)
    assert logits.shape == (BATCH,)
    # bf16-streamed gate pre-activations / bf16 W_hh operand => bf16-level tolerance.
    assert jnp.allclose(logits, ref, atol=2e-2, rtol=2e-2), (logits, ref)

    print("KERNEL_OK")
</pallas_src>

<mosaic_0001>
module attributes {stable_mosaic.version = 11 : i64} {
  func.func @_lstm_scan_kernel(%arg0: i32, %arg1: i32, %arg2: memref<8x16x512xbf16, #tpu.memory_space<vmem>>, %arg3: memref<128x512xbf16, #tpu.memory_space<any>>, %arg4: memref<16x128xf32, #tpu.memory_space<vmem>>, %arg5: memref<128x512xbf16, #tpu.memory_space<vmem>>, %arg6: memref<16x128xf32, #tpu.memory_space<vmem>>, %arg7: memref<16x128xf32, #tpu.memory_space<vmem>>, %arg8: memref<!tpu.dma_semaphore, #tpu.memory_space<semaphore_mem>>) attributes {dimension_semantics = [#tpu.dimension_semantics<parallel>, #tpu.dimension_semantics<arbitrary>], iteration_bounds = array<i64: 1, 1>, scalar_prefetch = 0 : i64, scratch_operands = 4 : i64, tpu.core_type = #tpu.core_type<tc>, window_params = [{transform_indices = @transform_0, window_bounds = array<i64: 8, 16, 512>}, {}, {transform_indices = @transform_2, window_bounds = array<i64: 16, 128>}]} {
    %c0_i32 = arith.constant 0 : i32
    %0 = arith.cmpi eq, %arg1, %c0_i32 : i32
    %1 = arith.extui %0 : i1 to i32
    %c0_i32_0 = arith.constant 0 : i32
    %2 = arith.cmpi ne, %1, %c0_i32_0 : i32
    scf.if %2 {
      tpu.enqueue_dma source(%arg3 : memref<128x512xbf16, #tpu.memory_space<any>>) target(%arg5 : memref<128x512xbf16, #tpu.memory_space<vmem>>) target_semaphore(%arg8 : memref<!tpu.dma_semaphore, #tpu.memory_space<semaphore_mem>>)
      %cst_58 = arith.constant 0.000000e+00 : f32
      %202 = vector.broadcast %cst_58 : f32 to vector<16x128xf32>
      %c0_59 = arith.constant 0 : index
      %c0_60 = arith.constant 0 : index
      %203 = vector.load %arg6[%c0_59, %c0_60] : memref<16x128xf32, #tpu.memory_space<vmem>>, vector<16x128xf32>
      tpu.vector_store %arg6[%c0_59, %c0_60], %202 {strides = array<i32>} : memref<16x128xf32, #tpu.memory_space<vmem>>, vector<16x128xf32>,
      %cst_61 = arith.constant 0.000000e+00 : f32
      %204 = vector.broadcast %cst_61 : f32 to vector<16x128xf32>
      %c0_62 = arith.constant 0 : index
      %c0_63 = arith.constant 0 : index
      %205 = vector.load %arg7[%c0_62, %c0_63] : memref<16x128xf32, #tpu.memory_space<vmem>>, vector<16x128xf32>
      tpu.vector_store %arg7[%c0_62, %c0_63], %204 {strides = array<i32>} : memref<16x128xf32, #tpu.memory_space<vmem>>, vector<16x128xf32>,
      tpu.wait_dma2 semaphore(%arg8 : memref<!tpu.dma_semaphore, #tpu.memory_space<semaphore_mem>>) src(%arg3 : memref<128x512xbf16, #tpu.memory_space<any>>) dst(%arg5 : memref<128x512xbf16, #tpu.memory_space<vmem>>)
    } else {
    }
    %c0 = arith.constant 0 : index
    %c0_1 = arith.constant 0 : index
    %3 = vector.load %arg6[%c0, %c0_1] : memref<16x128xf32, #tpu.memory_space<vmem>>, vector<16x128xf32>
    %c0_2 = arith.constant 0 : index
    %c0_3 = arith.constant 0 : index
    %4 = vector.load %arg7[%c0_2, %c0_3] : memref<16x128xf32, #tpu.memory_space<vmem>>, vector<16x128xf32>
    %c0_i32_4 = arith.constant 0 : i32
    %5 = arith.index_cast %c0_i32_4 : i32 to index
    %c0_5 = arith.constant 0 : index
    %c0_6 = arith.constant 0 : index
    %6 = vector.load %arg2[%5, %c0_5, %c0_6] : memref<8x16x512xbf16, #tpu.memory_space<vmem>>, vector<1x16x512xbf16>
    %7 = vector.shape_cast %6 : vector<1x16x512xbf16> to vector<16x512xbf16>
    %8 = arith.extf %7 : vector<16x512xbf16> to vector<16x512xf32>
    %9 = arith.truncf %3 : vector<16x128xf32> to vector<16x128xbf16>
    %c0_7 = arith.constant 0 : index
    %c0_8 = arith.constant 0 : index
    %10 = vector.load %arg5[%c0_7, %c0_8] : memref<128x512xbf16, #tpu.memory_space<vmem>>, vector<128x512xbf16>
    %cst = arith.constant dense<0.000000e+00> : vector<16x512xf32>
    %11 = tpu.matmul %9, %10, %cst {dimension_numbers = #tpu.dot_dimension_numbers<[1], [0], [0], [1], [0, 0, 1, 1], [], []>} : vector<16x128xbf16>, vector<128x512xbf16>, vector<16x512xf32> -> vector<16x512xf32>
    %12 = arith.addf %8, %11 : vector<16x512xf32>
    %13 = vector.extract_strided_slice %12 {offsets = [0, 0], sizes = [16, 384], strides = [1, 1]} : vector<16x512xf32> to vector<16x384xf32>
    %14 = arith.negf %13 : vector<16x384xf32>
    %15 = math.exp %14 : vector<16x384xf32>
    %cst_9 = arith.constant 1.000000e+00 : f32
    %16 = vector.broadcast %cst_9 : f32 to vector<16x384xf32>
    %17 = arith.addf %16, %15 : vector<16x384xf32>
    %18 = arith.divf %16, %17 : vector<16x384xf32>
    %19 = vector.extract_strided_slice %12 {offsets = [0, 384], sizes = [16, 128], strides = [1, 1]} : vector<16x512xf32> to vector<16x128xf32>
    %20 = math.tanh %19 : vector<16x128xf32>
    %21 = vector.extract_strided_slice %18 {offsets = [0, 0], sizes = [16, 128], strides = [1, 1]} : vector<16x384xf32> to vector<16x128xf32>
    %22 = vector.extract_strided_slice %18 {offsets = [0, 128], sizes = [16, 128], strides = [1, 1]} : vector<16x384xf32> to vector<16x128xf32>
    %23 = vector.extract_strided_slice %18 {offsets = [0, 256], sizes = [16, 128], strides = [1, 1]} : vector<16x384xf32> to vector<16x128xf32>
    %24 = arith.mulf %22, %4 : vector<16x128xf32>
    %25 = arith.mulf %21, %20 : vector<16x128xf32>
    %26 = arith.addf %24, %25 : vector<16x128xf32>
    %27 = math.tanh %26 : vector<16x128xf32>
    %28 = arith.mulf %23, %27 : vector<16x128xf32>
    %c1_i32 = arith.constant 1 : i32
    %29 = arith.index_cast %c1_i32 : i32 to index
    %c0_10 = arith.constant 0 : index
    %c0_11 = arith.constant 0 : index
    %30 = vector.load %arg2[%29, %c0_10, %c0_11] : memref<8x16x512xbf16, #tpu.memory_space<vmem>>, vector<1x16x512xbf16>
    %31 = vector.shape_cast %30 : vector<1x16x512xbf16> to vector<16x512xbf16>
    %32 = arith.extf %31 : vector<16x512xbf16> to vector<16x512xf32>
    %33 = arith.truncf %28 : vector<16x128xf32> to vector<16x128xbf16>
    %c0_12 = arith.constant 0 : index
    %c0_13 = arith.constant 0 : index
    %34 = vector.load %arg5[%c0_12, %c0_13] : memref<128x512xbf16, #tpu.memory_space<vmem>>, vector<128x512xbf16>
    %cst_14 = arith.constant dense<0.000000e+00> : vector<16x512xf32>
    %35 = tpu.matmul %33, %34, %cst_14 {dimension_numbers = #tpu.dot_dimension_numbers<[1], [0], [0], [1], [0, 0, 1, 1], [], []>} : vector<16x128xbf16>, vector<128x512xbf16>, vector<16x512xf32> -> vector<16x512xf32>
    %36 = arith.addf %32, %35 : vector<16x512xf32>
    %37 = vector.extract_strided_slice %36 {offsets = [0, 0], sizes = [16, 384], strides = [1, 1]} : vector<16x512xf32> to vector<16x384xf32>
    %38 = arith.negf %37 : vector<16x384xf32>
    %39 = math.exp %38 : vector<16x384xf32>
    %cst_15 = arith.constant 1.000000e+00 : f32
    %40 = vector.broadcast %cst_15 : f32 to vector<16x384xf32>
    %41 = arith.addf %40, %39 : vector<16x384xf32>
    %42 = arith.divf %40, %41 : vector<16x384xf32>
    %43 = vector.extract_strided_slice %36 {offsets = [0, 384], sizes = [16, 128], strides = [1, 1]} : vector<16x512xf32> to vector<16x128xf32>
    %44 = math.tanh %43 : vector<16x128xf32>
    %45 = vector.extract_strided_slice %42 {offsets = [0, 0], sizes = [16, 128], strides = [1, 1]} : vector<16x384xf32> to vector<16x128xf32>
    %46 = vector.extract_strided_slice %42 {offsets = [0, 128], sizes = [16, 128], strides = [1, 1]} : vector<16x384xf32> to vector<16x128xf32>
    %47 = vector.extract_strided_slice %42 {offsets = [0, 256], sizes = [16, 128], strides = [1, 1]} : vector<16x384xf32> to vector<16x128xf32>
    %48 = arith.mulf %46, %26 : vector<16x128xf32>
    %49 = arith.mulf %45, %44 : vector<16x128xf32>
    %50 = arith.addf %48, %49 : vector<16x128xf32>
    %51 = math.tanh %50 : vector<16x128xf32>
    %52 = arith.mulf %47, %51 : vector<16x128xf32>
    %c2_i32 = arith.constant 2 : i32
    %53 = arith.index_cast %c2_i32 : i32 to index
    %c0_16 = arith.constant 0 : index
    %c0_17 = arith.constant 0 : index
    %54 = vector.load %arg2[%53, %c0_16, %c0_17] : memref<8x16x512xbf16, #tpu.memory_space<vmem>>, vector<1x16x512xbf16>
    %55 = vector.shape_cast %54 : vector<1x16x512xbf16> to vector<16x512xbf16>
    %56 = arith.extf %55 : vector<16x512xbf16> to vector<16x512xf32>
    %57 = arith.truncf %52 : vector<16x128xf32> to vector<16x128xbf16>
    %c0_18 = arith.constant 0 : index
    %c0_19 = arith.constant 0 : index
    %58 = vector.load %arg5[%c0_18, %c0_19] : memref<128x512xbf16, #tpu.memory_space<vmem>>, vector<128x512xbf16>
    %cst_20 = arith.constant dense<0.000000e+00> : vector<16x512xf32>
    %59 = tpu.matmul %57, %58, %cst_20 {dimension_numbers = #tpu.dot_dimension_numbers<[1], [0], [0], [1], [0, 0, 1, 1], [], []>} : vector<16x128xbf16>, vector<128x512xbf16>, vector<16x512xf32> -> vector<16x512xf32>
    %60 = arith.addf %56, %59 : vector<16x512xf32>
    %61 = vector.extract_strided_slice %60 {offsets = [0, 0], sizes = [16, 384], strides = [1, 1]} : vector<16x512xf32> to vector<16x384xf32>
    %62 = arith.negf %61 : vector<16x384xf32>
    %63 = math.exp %62 : vector<16x384xf32>
    %cst_21 = arith.constant 1.000000e+00 : f32
    %64 = vector.broadcast %cst_21 : f32 to vector<16x384xf32>
    %65 = arith.addf %64, %63 : vector<16x384xf32>
    %66 = arith.divf %64, %65 : vector<16x384xf32>
    %67 = vector.extract_strided_slice %60 {offsets = [0, 384], sizes = [16, 128], strides = [1, 1]} : vector<16x512xf32> to vector<16x128xf32>
    %68 = math.tanh %67 : vector<16x128xf32>
    %69 = vector.extract_strided_slice %66 {offsets = [0, 0], sizes = [16, 128], strides = [1, 1]} : vector<16x384xf32> to vector<16x128xf32>
    %70 = vector.extract_strided_slice %66 {offsets = [0, 128], sizes = [16, 128], strides = [1, 1]} : vector<16x384xf32> to vector<16x128xf32>
    %71 = vector.extract_strided_slice %66 {offsets = [0, 256], sizes = [16, 128], strides = [1, 1]} : vector<16x384xf32> to vector<16x128xf32>
    %72 = arith.mulf %70, %50 : vector<16x128xf32>
    %73 = arith.mulf %69, %68 : vector<16x128xf32>
    %74 = arith.addf %72, %73 : vector<16x128xf32>
    %75 = math.tanh %74 : vector<16x128xf32>
    %76 = arith.mulf %71, %75 : vector<16x128xf32>
    %c3_i32 = arith.constant 3 : i32
    %77 = arith.index_cast %c3_i32 : i32 to index
    %c0_22 = arith.constant 0 : index
    %c0_23 = arith.constant 0 : index
    %78 = vector.load %arg2[%77, %c0_22, %c0_23] : memref<8x16x512xbf16, #tpu.memory_space<vmem>>, vector<1x16x512xbf16>
    %79 = vector.shape_cast %78 : vector<1x16x512xbf16> to vector<16x512xbf16>
    %80 = arith.extf %79 : vector<16x512xbf16> to vector<16x512xf32>
    %81 = arith.truncf %76 : vector<16x128xf32> to vector<16x128xbf16>
    %c0_24 = arith.constant 0 : index
    %c0_25 = arith.constant 0 : index
    %82 = vector.load %arg5[%c0_24, %c0_25] : memref<128x512xbf16, #tpu.memory_space<vmem>>, vector<128x512xbf16>
    %cst_26 = arith.constant dense<0.000000e+00> : vector<16x512xf32>
    %83 = tpu.matmul %81, %82, %cst_26 {dimension_numbers = #tpu.dot_dimension_numbers<[1], [0], [0], [1], [0, 0, 1, 1], [], []>} : vector<16x128xbf16>, vector<128x512xbf16>, vector<16x512xf32> -> vector<16x512xf32>
    %84 = arith.addf %80, %83 : vector<16x512xf32>
    %85 = vector.extract_strided_slice %84 {offsets = [0, 0], sizes = [16, 384], strides = [1, 1]} : vector<16x512xf32> to vector<16x384xf32>
    %86 = arith.negf %85 : vector<16x384xf32>
    %87 = math.exp %86 : vector<16x384xf32>
    %cst_27 = arith.constant 1.000000e+00 : f32
    %88 = vector.broadcast %cst_27 : f32 to vector<16x384xf32>
    %89 = arith.addf %88, %87 : vector<16x384xf32>
    %90 = arith.divf %88, %89 : vector<16x384xf32>
    %91 = vector.extract_strided_slice %84 {offsets = [0, 384], sizes = [16, 128], strides = [1, 1]} : vector<16x512xf32> to vector<16x128xf32>
    %92 = math.tanh %91 : vector<16x128xf32>
    %93 = vector.extract_strided_slice %90 {offsets = [0, 0], sizes = [16, 128], strides = [1, 1]} : vector<16x384xf32> to vector<16x128xf32>
    %94 = vector.extract_strided_slice %90 {offsets = [0, 128], sizes = [16, 128], strides = [1, 1]} : vector<16x384xf32> to vector<16x128xf32>
    %95 = vector.extract_strided_slice %90 {offsets = [0, 256], sizes = [16, 128], strides = [1, 1]} : vector<16x384xf32> to vector<16x128xf32>
    %96 = arith.mulf %94, %74 : vector<16x128xf32>
    %97 = arith.mulf %93, %92 : vector<16x128xf32>
    %98 = arith.addf %96, %97 : vector<16x128xf32>
    %99 = math.tanh %98 : vector<16x128xf32>
    %100 = arith.mulf %95, %99 : vector<16x128xf32>
    %c4_i32 = arith.constant 4 : i32
    %101 = arith.index_cast %c4_i32 : i32 to index
    %c0_28 = arith.constant 0 : index
    %c0_29 = arith.constant 0 : index
    %102 = vector.load %arg2[%101, %c0_28, %c0_29] : memref<8x16x512xbf16, #tpu.memory_space<vmem>>, vector<1x16x512xbf16>
    %103 = vector.shape_cast %102 : vector<1x16x512xbf16> to vector<16x512xbf16>
    %104 = arith.extf %103 : vector<16x512xbf16> to vector<16x512xf32>
    %105 = arith.truncf %100 : vector<16x128xf32> to vector<16x128xbf16>
    %c0_30 = arith.constant 0 : index
    %c0_31 = arith.constant 0 : index
    %106 = vector.load %arg5[%c0_30, %c0_31] : memref<128x512xbf16, #tpu.memory_space<vmem>>, vector<128x512xbf16>
    %cst_32 = arith.constant dense<0.000000e+00> : vector<16x512xf32>
    %107 = tpu.matmul %105, %106, %cst_32 {dimension_numbers = #tpu.dot_dimension_numbers<[1], [0], [0], [1], [0, 0, 1, 1], [], []>} : vector<16x128xbf16>, vector<128x512xbf16>, vector<16x512xf32> -> vector<16x512xf32>
    %108 = arith.addf %104, %107 : vector<16x512xf32>
    %109 = vector.extract_strided_slice %108 {offsets = [0, 0], sizes = [16, 384], strides = [1, 1]} : vector<16x512xf32> to vector<16x384xf32>
    %110 = arith.negf %109 : vector<16x384xf32>
    %111 = math.exp %110 : vector<16x384xf32>
    %cst_33 = arith.constant 1.000000e+00 : f32
    %112 = vector.broadcast %cst_33 : f32 to vector<16x384xf32>
    %113 = arith.addf %112, %111 : vector<16x384xf32>
    %114 = arith.divf %112, %113 : vector<16x384xf32>
    %115 = vector.extract_strided_slice %108 {offsets = [0, 384], sizes = [16, 128], strides = [1, 1]} : vector<16x512xf32> to vector<16x128xf32>
    %116 = math.tanh %115 : vector<16x128xf32>
    %117 = vector.extract_strided_slice %114 {offsets = [0, 0], sizes = [16, 128], strides = [1, 1]} : vector<16x384xf32> to vector<16x128xf32>
    %118 = vector.extract_strided_slice %114 {offsets = [0, 128], sizes = [16, 128], strides = [1, 1]} : vector<16x384xf32> to vector<16x128xf32>
    %119 = vector.extract_strided_slice %114 {offsets = [0, 256], sizes = [16, 128], strides = [1, 1]} : vector<16x384xf32> to vector<16x128xf32>
    %120 = arith.mulf %118, %98 : vector<16x128xf32>
    %121 = arith.mulf %117, %116 : vector<16x128xf32>
    %122 = arith.addf %120, %121 : vector<16x128xf32>
    %123 = math.tanh %122 : vector<16x128xf32>
    %124 = arith.mulf %119, %123 : vector<16x128xf32>
    %c5_i32 = arith.constant 5 : i32
    %125 = arith.index_cast %c5_i32 : i32 to index
    %c0_34 = arith.constant 0 : index
    %c0_35 = arith.constant 0 : index
    %126 = vector.load %arg2[%125, %c0_34, %c0_35] : memref<8x16x512xbf16, #tpu.memory_space<vmem>>, vector<1x16x512xbf16>
    %127 = vector.shape_cast %126 : vector<1x16x512xbf16> to vector<16x512xbf16>
    %128 = arith.extf %127 : vector<16x512xbf16> to vector<16x512xf32>
    %129 = arith.truncf %124 : vector<16x128xf32> to vector<16x128xbf16>
    %c0_36 = arith.constant 0 : index
    %c0_37 = arith.constant 0 : index
    %130 = vector.load %arg5[%c0_36, %c0_37] : memref<128x512xbf16, #tpu.memory_space<vmem>>, vector<128x512xbf16>
    %cst_38 = arith.constant dense<0.000000e+00> : vector<16x512xf32>
    %131 = tpu.matmul %129, %130, %cst_38 {dimension_numbers = #tpu.dot_dimension_numbers<[1], [0], [0], [1], [0, 0, 1, 1], [], []>} : vector<16x128xbf16>, vector<128x512xbf16>, vector<16x512xf32> -> vector<16x512xf32>
    %132 = arith.addf %128, %131 : vector<16x512xf32>
    %133 = vector.extract_strided_slice %132 {offsets = [0, 0], sizes = [16, 384], strides = [1, 1]} : vector<16x512xf32> to vector<16x384xf32>
    %134 = arith.negf %133 : vector<16x384xf32>
    %135 = math.exp %134 : vector<16x384xf32>
    %cst_39 = arith.constant 1.000000e+00 : f32
    %136 = vector.broadcast %cst_39 : f32 to vector<16x384xf32>
    %137 = arith.addf %136, %135 : vector<16x384xf32>
    %138 = arith.divf %136, %137 : vector<16x384xf32>
    %139 = vector.extract_strided_slice %132 {offsets = [0, 384], sizes = [16, 128], strides = [1, 1]} : vector<16x512xf32> to vector<16x128xf32>
    %140 = math.tanh %139 : vector<16x128xf32>
    %141 = vector.extract_strided_slice %138 {offsets = [0, 0], sizes = [16, 128], strides = [1, 1]} : vector<16x384xf32> to vector<16x128xf32>
    %142 = vector.extract_strided_slice %138 {offsets = [0, 128], sizes = [16, 128], strides = [1, 1]} : vector<16x384xf32> to vector<16x128xf32>
    %143 = vector.extract_strided_slice %138 {offsets = [0, 256], sizes = [16, 128], strides = [1, 1]} : vector<16x384xf32> to vector<16x128xf32>
    %144 = arith.mulf %142, %122 : vector<16x128xf32>
    %145 = arith.mulf %141, %140 : vector<16x128xf32>
    %146 = arith.addf %144, %145 : vector<16x128xf32>
    %147 = math.tanh %146 : vector<16x128xf32>
    %148 = arith.mulf %143, %147 : vector<16x128xf32>
    %c6_i32 = arith.constant 6 : i32
    %149 = arith.index_cast %c6_i32 : i32 to index
    %c0_40 = arith.constant 0 : index
    %c0_41 = arith.constant 0 : index
    %150 = vector.load %arg2[%149, %c0_40, %c0_41] : memref<8x16x512xbf16, #tpu.memory_space<vmem>>, vector<1x16x512xbf16>
    %151 = vector.shape_cast %150 : vector<1x16x512xbf16> to vector<16x512xbf16>
    %152 = arith.extf %151 : vector<16x512xbf16> to vector<16x512xf32>
    %153 = arith.truncf %148 : vector<16x128xf32> to vector<16x128xbf16>
    %c0_42 = arith.constant 0 : index
    %c0_43 = arith.constant 0 : index
    %154 = vector.load %arg5[%c0_42, %c0_43] : memref<128x512xbf16, #tpu.memory_space<vmem>>, vector<128x512xbf16>
    %cst_44 = arith.constant dense<0.000000e+00> : vector<16x512xf32>
    %155 = tpu.matmul %153, %154, %cst_44 {dimension_numbers = #tpu.dot_dimension_numbers<[1], [0], [0], [1], [0, 0, 1, 1], [], []>} : vector<16x128xbf16>, vector<128x512xbf16>, vector<16x512xf32> -> vector<16x512xf32>
    %156 = arith.addf %152, %155 : vector<16x512xf32>
    %157 = vector.extract_strided_slice %156 {offsets = [0, 0], sizes = [16, 384], strides = [1, 1]} : vector<16x512xf32> to vector<16x384xf32>
    %158 = arith.negf %157 : vector<16x384xf32>
    %159 = math.exp %158 : vector<16x384xf32>
    %cst_45 = arith.constant 1.000000e+00 : f32
    %160 = vector.broadcast %cst_45 : f32 to vector<16x384xf32>
    %161 = arith.addf %160, %159 : vector<16x384xf32>
    %162 = arith.divf %160, %161 : vector<16x384xf32>
    %163 = vector.extract_strided_slice %156 {offsets = [0, 384], sizes = [16, 128], strides = [1, 1]} : vector<16x512xf32> to vector<16x128xf32>
    %164 = math.tanh %163 : vector<16x128xf32>
    %165 = vector.extract_strided_slice %162 {offsets = [0, 0], sizes = [16, 128], strides = [1, 1]} : vector<16x384xf32> to vector<16x128xf32>
    %166 = vector.extract_strided_slice %162 {offsets = [0, 128], sizes = [16, 128], strides = [1, 1]} : vector<16x384xf32> to vector<16x128xf32>
    %167 = vector.extract_strided_slice %162 {offsets = [0, 256], sizes = [16, 128], strides = [1, 1]} : vector<16x384xf32> to vector<16x128xf32>
    %168 = arith.mulf %166, %146 : vector<16x128xf32>
    %169 = arith.mulf %165, %164 : vector<16x128xf32>
    %170 = arith.addf %168, %169 : vector<16x128xf32>
    %171 = math.tanh %170 : vector<16x128xf32>
    %172 = arith.mulf %167, %171 : vector<16x128xf32>
    %c7_i32 = arith.constant 7 : i32
    %173 = arith.index_cast %c7_i32 : i32 to index
    %c0_46 = arith.constant 0 : index
    %c0_47 = arith.constant 0 : index
    %174 = vector.load %arg2[%173, %c0_46, %c0_47] : memref<8x16x512xbf16, #tpu.memory_space<vmem>>, vector<1x16x512xbf16>
    %175 = vector.shape_cast %174 : vector<1x16x512xbf16> to vector<16x512xbf16>
    %176 = arith.extf %175 : vector<16x512xbf16> to vector<16x512xf32>
    %177 = arith.truncf %172 : vector<16x128xf32> to vector<16x128xbf16>
    %c0_48 = arith.constant 0 : index
    %c0_49 = arith.constant 0 : index
    %178 = vector.load %arg5[%c0_48, %c0_49] : memref<128x512xbf16, #tpu.memory_space<vmem>>, vector<128x512xbf16>
    %cst_50 = arith.constant dense<0.000000e+00> : vector<16x512xf32>
    %179 = tpu.matmul %177, %178, %cst_50 {dimension_numbers = #tpu.dot_dimension_numbers<[1], [0], [0], [1], [0, 0, 1, 1], [], []>} : vector<16x128xbf16>, vector<128x512xbf16>, vector<16x512xf32> -> vector<16x512xf32>
    %180 = arith.addf %176, %179 : vector<16x512xf32>
    %181 = vector.extract_strided_slice %180 {offsets = [0, 0], sizes = [16, 384], strides = [1, 1]} : vector<16x512xf32> to vector<16x384xf32>
    %182 = arith.negf %181 : vector<16x384xf32>
    %183 = math.exp %182 : vector<16x384xf32>
    %cst_51 = arith.constant 1.000000e+00 : f32
    %184 = vector.broadcast %cst_51 : f32 to vector<16x384xf32>
    %185 = arith.addf %184, %183 : vector<16x384xf32>
    %186 = arith.divf %184, %185 : vector<16x384xf32>
    %187 = vector.extract_strided_slice %180 {offsets = [0, 384], sizes = [16, 128], strides = [1, 1]} : vector<16x512xf32> to vector<16x128xf32>
    %188 = math.tanh %187 : vector<16x128xf32>
    %189 = vector.extract_strided_slice %186 {offsets = [0, 0], sizes = [16, 128], strides = [1, 1]} : vector<16x384xf32> to vector<16x128xf32>
    %190 = vector.extract_strided_slice %186 {offsets = [0, 128], sizes = [16, 128], strides = [1, 1]} : vector<16x384xf32> to vector<16x128xf32>
    %191 = vector.extract_strided_slice %186 {offsets = [0, 256], sizes = [16, 128], strides = [1, 1]} : vector<16x384xf32> to vector<16x128xf32>
    %192 = arith.mulf %190, %170 : vector<16x128xf32>
    %193 = arith.mulf %189, %188 : vector<16x128xf32>
    %194 = arith.addf %192, %193 : vector<16x128xf32>
    %195 = math.tanh %194 : vector<16x128xf32>
    %196 = arith.mulf %191, %195 : vector<16x128xf32>
    %c8_i32 = arith.constant 8 : i32
    %c0_52 = arith.constant 0 : index
    %c0_53 = arith.constant 0 : index
    %197 = vector.load %arg6[%c0_52, %c0_53] : memref<16x128xf32, #tpu.memory_space<vmem>>, vector<16x128xf32>
    tpu.vector_store %arg6[%c0_52, %c0_53], %196 {strides = array<i32>} : memref<16x128xf32, #tpu.memory_space<vmem>>, vector<16x128xf32>,
    %c0_54 = arith.constant 0 : index
    %c0_55 = arith.constant 0 : index
    %198 = vector.load %arg7[%c0_54, %c0_55] : memref<16x128xf32, #tpu.memory_space<vmem>>, vector<16x128xf32>
    tpu.vector_store %arg7[%c0_54, %c0_55], %194 {strides = array<i32>} : memref<16x128xf32, #tpu.memory_space<vmem>>, vector<16x128xf32>,
    %c0_i32_56 = arith.constant 0 : i32
    %199 = arith.cmpi eq, %arg1, %c0_i32_56 : i32
    %200 = arith.extui %199 : i1 to i32
    %c0_i32_57 = arith.constant 0 : i32
    %201 = arith.cmpi ne, %200, %c0_i32_57 : i32
    scf.if %201 {
      %c0_58 = arith.constant 0 : index
      %c0_59 = arith.constant 0 : index
      %202 = vector.load %arg6[%c0_58, %c0_59] : memref<16x128xf32, #tpu.memory_space<vmem>>, vector<16x128xf32>
      %c0_60 = arith.constant 0 : index
      %c0_61 = arith.constant 0 : index
      %203 = vector.load %arg4[%c0_60, %c0_61] : memref<16x128xf32, #tpu.memory_space<vmem>>, vector<16x128xf32>
      tpu.vector_store %arg4[%c0_60, %c0_61], %202 {strides = array<i32>} : memref<16x128xf32, #tpu.memory_space<vmem>>, vector<16x128xf32>,
    } else {
    }
    return
  }
  func.func @transform_0(%arg0: i32, %arg1: i32) -> (i32, i32, i32) {
    %c0_i32 = arith.constant 0 : i32
    %c0_i32_0 = arith.constant 0 : i32
    return %arg1, %arg0, %c0_i32 : i32, i32, i32
  }
  func.func @transform_2(%arg0: i32, %arg1: i32) -> (i32, i32) {
    %c0_i32 = arith.constant 0 : i32
    %c0_i32_0 = arith.constant 0 : i32
    return %arg0, %c0_i32 : i32, i32
  }
}

</mosaic_0001>

<bundles_post_ra>
// kernel: tpu_custom_call.1
= control target key start
LH: loop header
LB: loop body
LE: loop exit
PB: predicated region body
PF: predicated region fallthrough
CT: control target
= control target key end

     0   :  { %7 = vsyncpa [#allocation7], 0  ;;  %s2310_s0 = inlined_call_operand.hbm [shape: bf16[8,16,512], index: 0, kind: input, shape index: {}]   ;;  %s2311_s1 = inlined_call_operand.hbm [shape: bf16[128,512], index: 1, kind: input, shape index: {}]   ;;  %s2312_s2 = inlined_call_operand.hbm [shape: f32[16,128], index: 2, kind: output, shape index: {}]  }
   0x1   :  { %8 = vsyncpa [#allocation8], 0  ;;  %s1795_s9 = smov [#allocation6]   ;;  %s1745_s13 = scalar_lea.hbm %s2310_s0, 4096 }
   0x2   :  { %s14_s10 = sshll.u32 %s1795_s9, 4  ;;  %p1746_p0 = scmp.ne.s32.totalorder %s2310_s0, %s1745_s13  ;;  %s15_s10 = int_to_ptr.vmem [resolvable:$true] %s14_s10 }
   0x3   :  { %p1749_p1 = scmp.lt.u32.totalorder %s1745_s13, %s2310_s0 }
   0x5   :  { %p1751_p2 = pnand %p1749_p1, %p1746_p0 }
   0x7   :  { %1754 = shalt.err (!%p1751_p2)
}
   0x8   :  { %s1755_s18 = scalar_lea.vmem %s15_s10, 4096  ;;  %p1760_p4 = scmp.lt.s32.totalorder %s15_s10, %s15_s10 }
   0x9   :  { %p1756_p3 = scmp.ne.s32.totalorder %s15_s10, %s1755_s18  ;;  %p1761_p5 = scmp.lt.s32.totalorder %s1755_s18, %s1755_s18 }
   0xb   :  { %p1762_p6 = por %p1761_p5, %p1760_p4 }
   0xd   :  { %p1763_p7 = pnand %p1762_p6, %p1756_p3 }
   0xf   :  { %1766 = shalt.err (!%p1763_p7)
}
  0x10   :  { %s1796_s19 = smov 256   ;;  %s1797_s20 = smov 16  }
  0x11   :  { %20 = dma.hbm_to_vmem [thread:$0]  %s2310_s0, 4096, %s15_s10, [#allocation7], %s1796_s19, %s1796_s19, %s1797_s20  }
  0x12   :  { %1789 = dma.done.wait [#allocation7], 4096  }
  0x13   :  { %1790 = vsyncadd [#allocation7], 4294963200 }
  0x14   :  { %s33_s23 = sld [smem:[#allocation0]]   ;;  %s1798_s24 = smov [#allocation2]  }
  0x15   :  { %s41_s25 = sshll.u32 %s1798_s24, 4  ;;  %s1799_s26 = smov 512   ;;  %s42_s25 = int_to_ptr.vmem [resolvable:$true] %s41_s25 }
  0x16   :  { %45 = sst [smem:[#allocation11]] %s1799_s26  ;;  %s1800_s27 = smov 4  }
  0x17   :  { %47 = sst [smem:[#allocation11 + $0x1]] %s1799_s26  ;;  %s1801_s28 = smov 64  }
  0x18   :  { %49 = sst [smem:[#allocation11 + $0x2]] %s1800_s27  ;;  %s1802_s30 = smov 128  }
  0x19   :  { %51 = sst [smem:[#allocation11 + $0x3]] %s1801_s28  ;;  %s1803_s4 = smov 2  }
  0x1a   :  { %s1389_s29 = sshll.u32 %s33_s23, 26  ;;  %53 = sst [smem:[#allocation11 + $0x4]] %s1802_s30 }
  0x1b   :  { %s1390_s3 = sadd.s32 134217728, %s1389_s29  ;;  %55 = sst [smem:[#allocation11 + $0x5]] %s1803_s4 }
  0x1c   :  { %s1804_s0 = smov 256   ;;  %59 = sst [smem:[#allocation11 + $0x7]] %s1801_s28 }
  0x1d   :  { %57 = sst [smem:[#allocation11 + $0x6]] %s1804_s0  ;;  %s1805_s5 = smov [#allocation5]  }
  0x1e   :  { %61 = sst [smem:[#allocation11 + $0x8]] %s1800_s27  ;;  %s1806_s6 = smov [#allocation10]  }
  0x1f   :  { %63 = dma.general %s2311_s1, 4096, %s42_s25, %s1805_s5, %s1806_s6, [#allocation11], %s1390_s3, 0  }
  0x20   :  { %1791 = dma.done.wait [#allocation5], 4096 }
  0x21   :  { %1792 = vsyncadd [#allocation5], 4294963200  ;;  %v1842_v0 = vld [vmem:[#allocation2 + $0x8] sm:$0xff]  ;;  %v1844_v1 = vld [vmem:[#allocation2] sm:$0xff]  ;;  %v1807_v3 = vmov 0   ;;  %v1808_v33 = vmov 0.0|0.0  }
  0x22   :  { %v1846_v2 = vld [vmem:[#allocation2 + $0x28] sm:$0xff]  ;;  %121 = vmatprep.subr.bf16.mxu0 %v1842_v0  ;;  %153 = vmatprep.mubr.bf16.mxu0 %v1807_v3  ;;  %v1851_v4 = vld [vmem:[#allocation2 + $0x18] sm:$0xff]  ;;  %v1855_v5 = vld [vmem:[#allocation2 + $0x20] sm:$0xff]  ;;  %s1809_s1 = smov [#allocation9]  }
  0x23   :  { %122 = vmatpush1.bf16.msra.mxu0 %v1844_v1  ;;  %196 = vmatprep.mubr.bf16.mxu1 %v1807_v3  ;;  %v1858_v6 = vld [vmem:[#allocation2 + $0x10] sm:$0xff]  ;;  %v1860_v7 = vld [vmem:[#allocation2 + $0x38] sm:$0xff]  ;;  %v1862_v8 = vld [vmem:[#allocation2 + $0x48] sm:$0xff]  ;;  %s1371_s9 = sshll.u32 %s1809_s1, 4  ;;  %s1372_s9 = int_to_ptr.vmem [resolvable:$true] %s1371_s9 }
  0x24   :  { %123 = vmatprep.subr.bf16.mxu0 %v1846_v2  ;;  %164 = vmatprep.subr.bf16.mxu1 %v1851_v4  ;;  %v1866_v9 = vld [vmem:[#allocation2 + $0x30] sm:$0xff]  ;;  %v1869_v10 = vld [vmem:[#allocation2 + $0x58] sm:$0xff]  ;;  %v1872_v11 = vld [vmem:[#allocation2 + $0x40] sm:$0xff]  ;;  %s1767_s10 = scalar_lea.vmem %s1372_s9, 256  ;;  %p1772_p9 = scmp.lt.s32.totalorder %s1372_s9, %s1372_s9 }
  0x25   :  { %165 = vmatpush1.bf16.msra.mxu1 %v1858_v6  ;;  %v1874_v12 = vld [vmem:[#allocation2 + $0x68] sm:$0xff]  ;;  %v1878_v13 = vld [vmem:[#allocation2 + $0x50] sm:$0xff]  ;;  %v1881_v14 = vld [vmem:[#allocation2 + $0x78] sm:$0xff]  ;;  %p1768_p8 = scmp.ne.s32.totalorder %s1372_s9, %s1767_s10  ;;  %p1773_p10 = scmp.lt.s32.totalorder %s1767_s10, %s1767_s10 }
  0x26   :  { %166 = vmatprep.subr.bf16.mxu1 %v1860_v7  ;;  %v1884_v15 = vld [vmem:[#allocation2 + $0x60] sm:$0xff]  ;;  %v1886_v16 = vld [vmem:[#allocation2 + $0x88] sm:$0xff]  ;;  %v1890_v17 = vld [vmem:[#allocation2 + $0x70] sm:$0xff] }
  0x27   :  { %124 = vmatpush1.bf16.msra.mxu0 %v1855_v5  ;;  %v1893_v18 = vld [vmem:[#allocation2 + $0x98] sm:$0xff]  ;;  %v1896_v19 = vld [vmem:[#allocation2 + $0x80] sm:$0xff]  ;;  %v1898_v20 = vld [vmem:[#allocation2 + $0xa8] sm:$0xff]  ;;  %p1774_p11 = por %p1773_p10, %p1772_p9 }
  0x28   :  { %125 = vmatprep.subr.bf16.mxu0 %v1862_v8  ;;  %v1902_v21 = vld [vmem:[#allocation2 + $0x90] sm:$0xff]  ;;  %v1905_v22 = vld [vmem:[#allocation2 + $0xb8] sm:$0xff]  ;;  %v1908_v23 = vld [vmem:[#allocation2 + $0xa0] sm:$0xff] }
  0x29   :  { %167 = vmatpush1.bf16.msra.mxu1 %v1866_v9  ;;  %v1910_v24 = vld [vmem:[#allocation2 + $0xc8] sm:$0xff]  ;;  %v1914_v25 = vld [vmem:[#allocation2 + $0xb0] sm:$0xff]  ;;  %v1917_v26 = vld [vmem:[#allocation2 + $0xd8] sm:$0xff]  ;;  %p1775_p12 = pnand %p1774_p11, %p1768_p8 }
  0x2a   :  { %168 = vmatprep.subr.bf16.mxu1 %v1869_v10  ;;  %v1920_v27 = vld [vmem:[#allocation2 + $0xc0] sm:$0xff]  ;;  %v1922_v28 = vld [vmem:[#allocation2 + $0xe8] sm:$0xff]  ;;  %v1926_v29 = vld [vmem:[#allocation2 + $0xd0] sm:$0xff] }
  0x2b   :  { %126 = vmatpush1.bf16.msra.mxu0 %v1872_v11  ;;  %v1929_v30 = vld [vmem:[#allocation2 + $0xf8] sm:$0xff]  ;;  %v1932_v31 = vld [vmem:[#allocation2 + $0xe0] sm:$0xff]  ;;  %v1936_v32 = vld [vmem:[#allocation2 + $0xf0] sm:$0xff] }
  0x2c   :  { %127 = vmatprep.subr.bf16.mxu0 %v1874_v12  ;;  %v76_v34 = vld [vmem:[#allocation6] sm:$0xff]  ;;  %v78_v35 = vld [vmem:[#allocation6 + $0x10] sm:$0xff]  ;;  %v77_v39 = vld [vmem:[#allocation6 + $0x8] sm:$0xff] }
  0x2d   :  { %169 = vmatpush1.bf16.msra.mxu1 %v1878_v13  ;;  %v80_v36 = vunpack.c.l.bf16 %v76_v34  ;;  %v81_v37 = vunpack.c.h.bf16 %v76_v34  ;;  %v84_v38 = vunpack.c.l.bf16 %v78_v35  ;;  %v85_v41 = vunpack.c.h.bf16 %v78_v35  ;;  %v79_v44 = vld [vmem:[#allocation6 + $0x18] sm:$0xff] }
  0x2e   :  { %170 = vmatprep.subr.bf16.mxu1 %v1881_v14  ;;  %v82_v47 = vunpack.c.l.bf16 %v77_v39  ;;  %v86_v55 = vunpack.c.l.bf16 %v79_v44  ;;  %v83_v61 = vunpack.c.h.bf16 %v77_v39  ;;  %v87_v63 = vunpack.c.h.bf16 %v79_v44 }
  0x2f   :  { %128 = vmatpush1.bf16.msra.mxu0 %v1884_v15 }
  0x30   :  { %129 = vmatprep.subr.bf16.mxu0 %v1886_v16 }
  0x31   :  { %171 = vmatpush1.bf16.msra.mxu1 %v1890_v17 }
  0x32   :  { %172 = vmatprep.subr.bf16.mxu1 %v1893_v18 }
  0x33   :  { %130 = vmatpush1.bf16.msra.mxu0 %v1896_v19 }
  0x34   :  { %131 = vmatprep.subr.bf16.mxu0 %v1898_v20 }
  0x35   :  { %173 = vmatpush1.bf16.msra.mxu1 %v1902_v21 }
  0x36   :  { %174 = vmatprep.subr.bf16.mxu1 %v1905_v22 }
  0x37   :  { %132 = vmatpush1.bf16.msra.mxu0 %v1908_v23 }
  0x38   :  { %133 = vmatprep.subr.bf16.mxu0 %v1910_v24 }
  0x39   :  { %175 = vmatpush1.bf16.msra.mxu1 %v1914_v25 }
  0x3a   :  { %176 = vmatprep.subr.bf16.mxu1 %v1917_v26 }
  0x3b   :  { %134 = vmatpush1.bf16.msra.mxu0 %v1920_v27 }
  0x3c   :  { %135 = vmatprep.subr.bf16.mxu0 %v1922_v28 }
  0x3d   :  { %177 = vmatpush1.bf16.msra.mxu1 %v1926_v29 }
  0x3e   :  { %178 = vmatprep.subr.bf16.mxu1 %v1929_v30 }
  0x3f   :  { %136 = vmatpush1.bf16.msra.mxu0 %v1932_v31 }
  0x40   :  { %277 = vmatprep.subr.bf16.mxu0 %v1842_v0 }
  0x41   :  { %179 = vmatpush1.bf16.msra.mxu1 %v1936_v32 }
  0x42   :  { %154 = vmatmul.mubr.bf16.vlgmr.msra.gmra.mrb[0].mxu0 %v1808_v33  ;;  %320 = vmatprep.subr.bf16.mxu1 %v1851_v4 }
  0x43   :  { %278 = vmatpush1.bf16.msra.mxu0 %v1844_v1  ;;  %309 = vmatprep.mubr.bf16.mxu0 %v1807_v3 }
  0x44   :  { %197 = vmatmul.mubr.bf16.vlgmr.msra.gmra.mrb[0].mxu1 %v1808_v33  ;;  %279 = vmatprep.subr.bf16.mxu0 %v1846_v2 }
  0x45   :  { %321 = vmatpush1.bf16.msra.mxu1 %v1858_v6  ;;  %352 = vmatprep.mubr.bf16.mxu1 %v1807_v3 }
  0x46   :  { %322 = vmatprep.subr.bf16.mxu1 %v1860_v7 }
  0x47   :  { %280 = vmatpush1.bf16.msra.mxu0 %v1855_v5 }
  0x48   :  { %281 = vmatprep.subr.bf16.mxu0 %v1862_v8 }
  0x49   :  { %323 = vmatpush1.bf16.msra.mxu1 %v1866_v9 }
  0x4a   :  { %324 = vmatprep.subr.bf16.mxu1 %v1869_v10 }
  0x4b   :  { %282 = vmatpush1.bf16.msra.mxu0 %v1872_v11 }
  0x4c   :  { %283 = vmatprep.subr.bf16.mxu0 %v1874_v12 }
  0x4d   :  { %325 = vmatpush1.bf16.msra.mxu1 %v1878_v13 }
  0x4e   :  { %326 = vmatprep.subr.bf16.mxu1 %v1881_v14 }
  0x4f   :  { %284 = vmatpush1.bf16.msra.mxu0 %v1884_v15 }
  0x50   :  { %285 = vmatprep.subr.bf16.mxu0 %v1886_v16 }
  0x51   :  { %327 = vmatpush1.bf16.msra.mxu1 %v1890_v17 }
  0x52   :  { %328 = vmatprep.subr.bf16.mxu1 %v1893_v18 }
  0x53   :  { %286 = vmatpush1.bf16.msra.mxu0 %v1896_v19 }
  0x54   :  { %287 = vmatprep.subr.bf16.mxu0 %v1898_v20 }
  0x55   :  { %329 = vmatpush1.bf16.msra.mxu1 %v1902_v21 }
  0x56   :  { %330 = vmatprep.subr.bf16.mxu1 %v1905_v22 }
  0x57   :  { %288 = vmatpush1.bf16.msra.mxu0 %v1908_v23 }
  0x58   :  { %289 = vmatprep.subr.bf16.mxu0 %v1910_v24 }
  0x59   :  { %331 = vmatpush1.bf16.msra.mxu1 %v1914_v25 }
  0x5a   :  { %332 = vmatprep.subr.bf16.mxu1 %v1917_v26 }
  0x5b   :  { %290 = vmatpush1.bf16.msra.mxu0 %v1920_v27 }
  0x5c   :  { %291 = vmatprep.subr.bf16.mxu0 %v1922_v28 }
  0x5d   :  { %333 = vmatpush1.bf16.msra.mxu1 %v1926_v29 }
  0x5e   :  { %334 = vmatprep.subr.bf16.mxu1 %v1929_v30 }
  0x5f   :  { %292 = vmatpush1.bf16.msra.mxu0 %v1932_v31 }
  0x60   :  { %433 = vmatprep.subr.bf16.mxu0 %v1842_v0 }
  0x61   :  { %335 = vmatpush1.bf16.msra.mxu1 %v1936_v32 }
  0x62   :  { %476 = vmatprep.subr.bf16.mxu1 %v1851_v4 }
 0x115   :  { %v155_v40 = vpop.f32.mrb[0].mxu0 }
 0x116   :  { %v207_v42 = vadd.f32 %v155_v40, %v80_v36  ;;  %v157_v43 = vpop.f32.mrb[1].mxu0 }
 0x117   :  { %v208_v45 = vadd.f32 %v157_v43, %v81_v37  ;;  %v159_v46 = vpop.f32.mrb[2].mxu0  ;;  %v198_v48 = vpop.f32.mrb[0].mxu1 }
 0x118   :  { %v1391_v49 = vmul.f32 -1.442695, %v207_v42  ;;  %v211_v50 = vadd.f32 %v159_v46, %v84_v38  ;;  %v161_v51 = vpop.f32.mrb[3].mxu0  ;;  %v200_v52 = vpop.f32.mrb[1].mxu1  ;;  %v209_v60 = vadd.f32 %v198_v48, %v82_v47 }
 0x119   :  { %v1392_v53 = vmul.f32 -1.442695, %v208_v45  ;;  %v212_v54 = vadd.f32 %v161_v51, %v85_v41  ;;  %v202_v56 = vpop.f32.mrb[2].mxu1  ;;  %v210_v34 = vadd.f32 %v200_v52, %v83_v61 }
 0x11a   :  { %1457 = vpow2.f32 %v1391_v49  ;;  %v1394_v57 = vmul.f32 -1.442695, %v211_v50  ;;  %v204_v58 = vpop.f32.mrb[3].mxu1  ;;  %v213_v62 = vadd.f32 %v202_v56, %v86_v55  ;;  %v1393_v33 = vmul.f32 -1.442695, %v209_v60 }
 0x11b   :  { %1459 = vpow2.f32 %v1392_v53  ;;  %v1395_v59 = vmul.f32 -1.442695, %v212_v54  ;;  %v214_v36 = vadd.f32 %v204_v58, %v87_v63 }
 0x11c   :  { %1461 = vpow2.f32 %v1394_v57  ;;  %v1396_v35 = vmul.f32 -1.442695, %v213_v62 }
 0x11d   :  { %1463 = vpow2.f32 %v1395_v59 }
 0x11e   :  { %1465 = vpow2.f32 %v1393_v33 }
 0x11f   :  { %1467 = vtanh.f32 %v210_v34 }
 0x120   :  { %1469 = vpow2.f32 %v1396_v35 }
 0x121   :  { %1471 = vtanh.f32 %v214_v36 }
 0x124   :  { %v1458_v37 = vpop.eup %1457 }
 0x125   :  { %v1460_v38 = vpop.eup %1459  ;;  %v233_v40 = vadd.f32 1.0, %v1458_v37  ;;  %v264_v37 = vld [vmem:[#allocation6 + $0x20] sm:$0xff] }
 0x126   :  { %v1462_v41 = vpop.eup %1461  ;;  %v234_v42 = vadd.f32 1.0, %v1460_v38  ;;  %v266_v38 = vld [vmem:[#allocation6 + $0x30] sm:$0xff] }
 0x127   :  { %v1464_v43 = vpop.eup %1463  ;;  %1473 = vrcp.f32 %v233_v40  ;;  %v236_v45 = vadd.f32 1.0, %v1462_v41  ;;  %v268_v40 = vunpack.c.l.bf16 %v264_v37  ;;  %v269_v41 = vunpack.c.h.bf16 %v264_v37 }
 0x128   :  { %1475 = vrcp.f32 %v234_v42  ;;  %v237_v39 = vadd.f32 1.0, %v1464_v43  ;;  %v1466_v44 = vpop.eup %1465  ;;  %v272_v42 = vunpack.c.l.bf16 %v266_v38 }
 0x129   :  { %1477 = vrcp.f32 %v236_v45  ;;  %v1468_v46 = vpop.eup %1467  ;;  %v235_v51 = vadd.f32 1.0, %v1466_v44 }
 0x12a   :  { %1479 = vrcp.f32 %v237_v39  ;;  %v1470_v47 = vpop.eup %1469  ;;  %v273_v39 = vunpack.c.h.bf16 %v266_v38 }
 0x12b   :  { %v1472_v48 = vpop.eup %1471  ;;  %v238_v56 = vadd.f32 1.0, %v1470_v47  ;;  %1481 = vrcp.f32 %v235_v51  ;;  %v267_v51 = vld [vmem:[#allocation6 + $0x38] sm:$0xff] }
 0x12c   :  { %v275_v38 = vunpack.c.h.bf16 %v267_v51 }
 0x131   :  { %v1474_v49 = vpop.eup %1473 }
 0x132   :  { %v1476_v50 = vpop.eup %1475  ;;  %v255_v52 = vmul.f32 %v1474_v49, %v1468_v46  ;;  %v265_v46 = vld [vmem:[#allocation6 + $0x28] sm:$0xff] }
 0x133   :  { %v1478_v53 = vpop.eup %1477  ;;  %v253_v54 = vmul.f32 0.0, %v1476_v50 }
 0x134   :  { %v1480_v55 = vpop.eup %1479  ;;  %v256_v57 = vmul.f32 %v1478_v53, %v1472_v48 }
 0x135   :  { %v254_v58 = vmul.f32 0.0, %v1480_v55  ;;  %v1976_v59 = vadd.f32 %v255_v52, %v253_v54  ;;  %v1482_v61 = vpop.eup %1481 }
 0x137   :  { %1483 = vtanh.f32 %v1976_v59  ;;  %v1979_v60 = vadd.f32 %v256_v57, %v254_v58  ;;  %v270_v57 = vunpack.c.l.bf16 %v265_v46 }
 0x138   :  { %1485 = vrcp.f32 %v238_v56 }
 0x139   :  { %1487 = vtanh.f32 %v1979_v60 }
 0x141   :  { %v1484_v62 = vpop.eup %1483 }
 0x142   :  { %v1486_v63 = vpop.eup %1485  ;;  %v261_v34 = vmul.f32 %v1484_v62, %v1482_v61 }
 0x143   :  { %v1488_v33 = vpop.eup %1487 }
 0x144   :  { %v262_v35 = vmul.f32 %v1488_v33, %v1486_v63  ;;  %v274_v63 = vunpack.c.l.bf16 %v267_v51 }
 0x146   :  { %v276_v36 = vpack.c.bf16 %v262_v35, %v261_v34  ;;  %v271_v34 = vunpack.c.h.bf16 %v265_v46 }
 0x148   :  { %310 = vmatmul.mubr.bf16.vlgmr.msra.gmra.mrb[4].mxu0 %v276_v36  ;;  %353 = vmatmul.mubr.bf16.vlgmr.msra.gmra.mrb[4].mxu1 %v276_v36 }
 0x149   :  { %434 = vmatpush1.bf16.msra.mxu0 %v1844_v1  ;;  %477 = vmatpush1.bf16.msra.mxu1 %v1858_v6 }
 0x14a   :  { %435 = vmatprep.subr.bf16.mxu0 %v1846_v2  ;;  %478 = vmatprep.subr.bf16.mxu1 %v1860_v7 }
 0x14b   :  { %465 = vmatprep.mubr.bf16.mxu0 %v1807_v3  ;;  %508 = vmatprep.mubr.bf16.mxu1 %v1807_v3 }
 0x14d   :  { %436 = vmatpush1.bf16.msra.mxu0 %v1855_v5  ;;  %479 = vmatpush1.bf16.msra.mxu1 %v1866_v9 }
 0x14e   :  { %437 = vmatprep.subr.bf16.mxu0 %v1862_v8  ;;  %480 = vmatprep.subr.bf16.mxu1 %v1869_v10 }
 0x151   :  { %438 = vmatpush1.bf16.msra.mxu0 %v1872_v11  ;;  %481 = vmatpush1.bf16.msra.mxu1 %v1878_v13 }
 0x152   :  { %439 = vmatprep.subr.bf16.mxu0 %v1874_v12  ;;  %482 = vmatprep.subr.bf16.mxu1 %v1881_v14 }
 0x155   :  { %440 = vmatpush1.bf16.msra.mxu0 %v1884_v15  ;;  %483 = vmatpush1.bf16.msra.mxu1 %v1890_v17 }
 0x156   :  { %441 = vmatprep.subr.bf16.mxu0 %v1886_v16  ;;  %484 = vmatprep.subr.bf16.mxu1 %v1893_v18 }
 0x159   :  { %442 = vmatpush1.bf16.msra.mxu0 %v1896_v19  ;;  %485 = vmatpush1.bf16.msra.mxu1 %v1902_v21 }
 0x15a   :  { %443 = vmatprep.subr.bf16.mxu0 %v1898_v20  ;;  %486 = vmatprep.subr.bf16.mxu1 %v1905_v22 }
 0x15d   :  { %444 = vmatpush1.bf16.msra.mxu0 %v1908_v23  ;;  %487 = vmatpush1.bf16.msra.mxu1 %v1914_v25 }
 0x15e   :  { %445 = vmatprep.subr.bf16.mxu0 %v1910_v24  ;;  %488 = vmatprep.subr.bf16.mxu1 %v1917_v26 }
 0x161   :  { %446 = vmatpush1.bf16.msra.mxu0 %v1920_v27  ;;  %489 = vmatpush1.bf16.msra.mxu1 %v1926_v29 }
 0x162   :  { %447 = vmatprep.subr.bf16.mxu0 %v1922_v28  ;;  %490 = vmatprep.subr.bf16.mxu1 %v1929_v30 }
 0x165   :  { %448 = vmatpush1.bf16.msra.mxu0 %v1932_v31  ;;  %491 = vmatpush1.bf16.msra.mxu1 %v1936_v32 }
 0x166   :  { %589 = vmatprep.subr.bf16.mxu0 %v1842_v0  ;;  %632 = vmatprep.subr.bf16.mxu1 %v1851_v4 }
 0x21b   :  { %v311_v43 = vpop.f32.mrb[4].mxu0  ;;  %v354_v45 = vpop.f32.mrb[4].mxu1 }
 0x21c   :  { %v363_v44 = vadd.f32 %v311_v43, %v268_v40  ;;  %v313_v47 = vpop.f32.mrb[5].mxu0  ;;  %v356_v48 = vpop.f32.mrb[5].mxu1  ;;  %v365_v35 = vadd.f32 %v354_v45, %v270_v57 }
 0x21d   :  { %v364_v49 = vadd.f32 %v313_v47, %v269_v41  ;;  %v315_v50 = vpop.f32.mrb[6].mxu0  ;;  %v358_v52 = vpop.f32.mrb[6].mxu1  ;;  %v366_v37 = vadd.f32 %v356_v48, %v271_v34 }
 0x21e   :  { %v1397_v53 = vmul.f32 -1.442695, %v363_v44  ;;  %v367_v54 = vadd.f32 %v315_v50, %v272_v42  ;;  %v317_v55 = vpop.f32.mrb[7].mxu0  ;;  %v360_v56 = vpop.f32.mrb[7].mxu1  ;;  %v369_v36 = vadd.f32 %v358_v52, %v274_v63  ;;  %v1399_v40 = vmul.f32 -1.442695, %v365_v35 }
 0x21f   :  { %v1398_v58 = vmul.f32 -1.442695, %v364_v49  ;;  %v368_v61 = vadd.f32 %v317_v55, %v273_v39  ;;  %v370_v43 = vadd.f32 %v360_v56, %v275_v38 }
 0x220   :  { %1489 = vpow2.f32 %v1397_v53  ;;  %v1400_v62 = vmul.f32 -1.442695, %v367_v54  ;;  %v1402_v41 = vmul.f32 -1.442695, %v369_v36 }
 0x221   :  { %v1401_v33 = vmul.f32 -1.442695, %v368_v61  ;;  %1491 = vpow2.f32 %v1398_v58 }
 0x222   :  { %1493 = vpow2.f32 %v1400_v62 }
 0x223   :  { %1495 = vpow2.f32 %v1401_v33 }
 0x224   :  { %1497 = vtanh.f32 %v366_v37 }
 0x225   :  { %1499 = vpow2.f32 %v1399_v40 }
 0x226   :  { %1501 = vpow2.f32 %v1402_v41 }
 0x22a   :  { %v1490_v42 = vpop.eup %1489 }
 0x22b   :  { %v389_v44 = vadd.f32 1.0, %v1490_v42  ;;  %v1492_v39 = vpop.eup %1491 }
 0x22c   :  { %v1494_v47 = vpop.eup %1493  ;;  %v390_v49 = vadd.f32 1.0, %v1492_v39 }
 0x22d   :  { %1503 = vrcp.f32 %v389_v44  ;;  %v392_v50 = vadd.f32 1.0, %v1494_v47  ;;  %v1496_v45 = vpop.eup %1495  ;;  %v422_v44 = vld [vmem:[#allocation6 + $0x50] sm:$0xff] }
 0x22e   :  { %1505 = vtanh.f32 %v370_v43  ;;  %v393_v46 = vadd.f32 1.0, %v1496_v45  ;;  %v1498_v48 = vpop.eup %1497 }
 0x22f   :  { %1507 = vrcp.f32 %v390_v49  ;;  %v1500_v51 = vpop.eup %1499  ;;  %v428_v49 = vunpack.c.l.bf16 %v422_v44 }
 0x230   :  { %1509 = vrcp.f32 %v392_v50  ;;  %v1502_v52 = vpop.eup %1501  ;;  %v391_v58 = vadd.f32 1.0, %v1500_v51  ;;  %v421_v51 = vld [vmem:[#allocation6 + $0x48] sm:$0xff] }
 0x231   :  { %1511 = vrcp.f32 %v393_v46  ;;  %v394_v34 = vadd.f32 1.0, %v1502_v52  ;;  %v429_v46 = vunpack.c.h.bf16 %v422_v44 }
 0x232   :  { %1513 = vrcp.f32 %v391_v58 }
 0x237   :  { %v1504_v53 = vpop.eup %1503 }
 0x238   :  { %v1506_v54 = vpop.eup %1505  ;;  %v411_v55 = vmul.f32 %v1504_v53, %v1498_v48 }
 0x239   :  { %v1508_v56 = vpop.eup %1507 }
 0x23a   :  { %v1510_v57 = vpop.eup %1509  ;;  %v409_v61 = vmul.f32 %v1508_v56, %v1976_v59  ;;  %v423_v56 = vld [vmem:[#allocation6 + $0x58] sm:$0xff] }
 0x23b   :  { %v412_v62 = vmul.f32 %v1510_v57, %v1506_v54  ;;  %v1512_v63 = vpop.eup %1511  ;;  %v431_v44 = vunpack.c.h.bf16 %v423_v56 }
 0x23c   :  { %v2017_v33 = vadd.f32 %v411_v55, %v409_v61  ;;  %v410_v35 = vmul.f32 %v1512_v63, %v1979_v60  ;;  %v1514_v37 = vpop.eup %1513  ;;  %v420_v60 = vld [vmem:[#allocation6 + $0x40] sm:$0xff] }
 0x23d   :  { %v424_v39 = vunpack.c.l.bf16 %v420_v60  ;;  %v425_v47 = vunpack.c.h.bf16 %v420_v60 }
 0x23e   :  { %1515 = vtanh.f32 %v2017_v33  ;;  %v2021_v36 = vadd.f32 %v412_v62, %v410_v35 }
 0x23f   :  { %1517 = vrcp.f32 %v394_v34  ;;  %v426_v34 = vunpack.c.l.bf16 %v421_v51 }
 0x240   :  { %1519 = vtanh.f32 %v2021_v36 }
 0x248   :  { %v1516_v38 = vpop.eup %1515 }
 0x249   :  { %v1518_v40 = vpop.eup %1517  ;;  %v417_v59 = vmul.f32 %v1516_v38, %v1514_v37 }
 0x24a   :  { %v1520_v41 = vpop.eup %1519 }
 0x24b   :  { %v418_v42 = vmul.f32 %v1520_v41, %v1518_v40  ;;  %v430_v40 = vunpack.c.l.bf16 %v423_v56 }
 0x24d   :  { %v432_v43 = vpack.c.bf16 %v418_v42, %v417_v59  ;;  %v427_v59 = vunpack.c.h.bf16 %v421_v51 }
 0x24f   :  { %466 = vmatmul.mubr.bf16.vlgmr.msra.gmra.mrb[8].mxu0 %v432_v43  ;;  %509 = vmatmul.mubr.bf16.vlgmr.msra.gmra.mrb[8].mxu1 %v432_v43 }
 0x250   :  { %590 = vmatpush1.bf16.msra.mxu0 %v1844_v1  ;;  %633 = vmatpush1.bf16.msra.mxu1 %v1858_v6 }
 0x251   :  { %591 = vmatprep.subr.bf16.mxu0 %v1846_v2  ;;  %634 = vmatprep.subr.bf16.mxu1 %v1860_v7 }
 0x252   :  { %621 = vmatprep.mubr.bf16.mxu0 %v1807_v3  ;;  %664 = vmatprep.mubr.bf16.mxu1 %v1807_v3 }
 0x254   :  { %592 = vmatpush1.bf16.msra.mxu0 %v1855_v5  ;;  %635 = vmatpush1.bf16.msra.mxu1 %v1866_v9 }
 0x255   :  { %593 = vmatprep.subr.bf16.mxu0 %v1862_v8  ;;  %636 = vmatprep.subr.bf16.mxu1 %v1869_v10 }
 0x258   :  { %594 = vmatpush1.bf16.msra.mxu0 %v1872_v11  ;;  %637 = vmatpush1.bf16.msra.mxu1 %v1878_v13 }
 0x259   :  { %595 = vmatprep.subr.bf16.mxu0 %v1874_v12  ;;  %638 = vmatprep.subr.bf16.mxu1 %v1881_v14 }
 0x25c   :  { %596 = vmatpush1.bf16.msra.mxu0 %v1884_v15  ;;  %639 = vmatpush1.bf16.msra.mxu1 %v1890_v17 }
 0x25d   :  { %597 = vmatprep.subr.bf16.mxu0 %v1886_v16  ;;  %640 = vmatprep.subr.bf16.mxu1 %v1893_v18 }
 0x260   :  { %598 = vmatpush1.bf16.msra.mxu0 %v1896_v19  ;;  %641 = vmatpush1.bf16.msra.mxu1 %v1902_v21 }
 0x261   :  { %599 = vmatprep.subr.bf16.mxu0 %v1898_v20  ;;  %642 = vmatprep.subr.bf16.mxu1 %v1905_v22 }
 0x264   :  { %600 = vmatpush1.bf16.msra.mxu0 %v1908_v23  ;;  %643 = vmatpush1.bf16.msra.mxu1 %v1914_v25 }
 0x265   :  { %601 = vmatprep.subr.bf16.mxu0 %v1910_v24  ;;  %644 = vmatprep.subr.bf16.mxu1 %v1917_v26 }
 0x268   :  { %602 = vmatpush1.bf16.msra.mxu0 %v1920_v27  ;;  %645 = vmatpush1.bf16.msra.mxu1 %v1926_v29 }
 0x269   :  { %603 = vmatprep.subr.bf16.mxu0 %v1922_v28  ;;  %646 = vmatprep.subr.bf16.mxu1 %v1929_v30 }
 0x26c   :  { %604 = vmatpush1.bf16.msra.mxu0 %v1932_v31  ;;  %647 = vmatpush1.bf16.msra.mxu1 %v1936_v32 }
 0x26d   :  { %745 = vmatprep.subr.bf16.mxu0 %v1842_v0  ;;  %788 = vmatprep.subr.bf16.mxu1 %v1851_v4 }
 0x322   :  { %v467_v50 = vpop.f32.mrb[8].mxu0  ;;  %v510_v45 = vpop.f32.mrb[8].mxu1 }
 0x323   :  { %v519_v48 = vadd.f32 %v467_v50, %v424_v39  ;;  %v469_v52 = vpop.f32.mrb[9].mxu0  ;;  %v512_v53 = vpop.f32.mrb[9].mxu1  ;;  %v521_v42 = vadd.f32 %v510_v45, %v426_v34 }
 0x324   :  { %v520_v54 = vadd.f32 %v469_v52, %v425_v47  ;;  %v471_v55 = vpop.f32.mrb[10].mxu0  ;;  %v514_v57 = vpop.f32.mrb[10].mxu1  ;;  %v522_v60 = vadd.f32 %v512_v53, %v427_v59 }
 0x325   :  { %v1403_v58 = vmul.f32 -1.442695, %v519_v48  ;;  %v523_v61 = vadd.f32 %v471_v55, %v428_v49  ;;  %v473_v62 = vpop.f32.mrb[11].mxu0  ;;  %v516_v63 = vpop.f32.mrb[11].mxu1  ;;  %v525_v43 = vadd.f32 %v514_v57, %v430_v40  ;;  %v1405_v39 = vmul.f32 -1.442695, %v521_v42 }
 0x326   :  { %v1404_v35 = vmul.f32 -1.442695, %v520_v54  ;;  %v524_v37 = vadd.f32 %v473_v62, %v429_v46  ;;  %v526_v50 = vadd.f32 %v516_v63, %v431_v44 }
 0x327   :  { %1521 = vpow2.f32 %v1403_v58  ;;  %v1406_v38 = vmul.f32 -1.442695, %v523_v61  ;;  %v1408_v47 = vmul.f32 -1.442695, %v525_v43 }
 0x328   :  { %v1407_v41 = vmul.f32 -1.442695, %v524_v37  ;;  %1523 = vpow2.f32 %v1404_v35 }
 0x329   :  { %1525 = vpow2.f32 %v1406_v38 }
 0x32a   :  { %1527 = vpow2.f32 %v1407_v41 }
 0x32b   :  { %1529 = vtanh.f32 %v522_v60 }
 0x32c   :  { %1531 = vpow2.f32 %v1405_v39 }
 0x32d   :  { %1533 = vpow2.f32 %v1408_v47 }
 0x331   :  { %v1522_v49 = vpop.eup %1521 }
 0x332   :  { %v545_v48 = vadd.f32 1.0, %v1522_v49  ;;  %v1524_v46 = vpop.eup %1523 }
 0x333   :  { %v1526_v52 = vpop.eup %1525  ;;  %v546_v54 = vadd.f32 1.0, %v1524_v46 }
 0x334   :  { %1535 = vrcp.f32 %v545_v48  ;;  %v548_v55 = vadd.f32 1.0, %v1526_v52  ;;  %v1528_v45 = vpop.eup %1527 }
 0x335   :  { %1537 = vtanh.f32 %v526_v50  ;;  %v549_v51 = vadd.f32 1.0, %v1528_v45  ;;  %v1530_v53 = vpop.eup %1529 }
 0x336   :  { %1539 = vrcp.f32 %v546_v54  ;;  %v1532_v56 = vpop.eup %1531 }
 0x337   :  { %1541 = vrcp.f32 %v548_v55  ;;  %v1534_v57 = vpop.eup %1533  ;;  %v547_v35 = vadd.f32 1.0, %v1532_v56 }
 0x338   :  { %1543 = vrcp.f32 %v549_v51  ;;  %v550_v59 = vadd.f32 1.0, %v1534_v57 }
 0x339   :  { %1545 = vrcp.f32 %v547_v35 }
 0x33e   :  { %v1536_v58 = vpop.eup %1535 }
 0x33f   :  { %v1538_v61 = vpop.eup %1537  ;;  %v567_v62 = vmul.f32 %v1536_v58, %v1530_v53 }
 0x340   :  { %v1540_v63 = vpop.eup %1539 }
 0x341   :  { %v1542_v34 = vpop.eup %1541  ;;  %v565_v37 = vmul.f32 %v1540_v63, %v2017_v33 }
 0x342   :  { %v568_v38 = vmul.f32 %v1542_v34, %v1538_v61  ;;  %v1544_v40 = vpop.eup %1543 }
 0x343   :  { %v2059_v41 = vadd.f32 %v567_v62, %v565_v37  ;;  %v566_v42 = vmul.f32 %v1544_v40, %v2021_v36  ;;  %v1546_v60 = vpop.eup %1545 }
 0x345   :  { %1547 = vtanh.f32 %v2059_v41  ;;  %v2063_v43 = vadd.f32 %v568_v38, %v566_v42 }
 0x346   :  { %1549 = vrcp.f32 %v550_v59 }
 0x347   :  { %1551 = vtanh.f32 %v2063_v43 }
 0x34f   :  { %v1548_v44 = vpop.eup %1547 }
 0x350   :  { %v1550_v39 = vpop.eup %1549  ;;  %v573_v33 = vmul.f32 %v1548_v44, %v1546_v60 }
 0x351   :  { %v1552_v47 = vpop.eup %1551 }
 0x352   :  { %v574_v49 = vmul.f32 %v1552_v47, %v1550_v39 }
 0x354   :  { %v588_v50 = vpack.c.bf16 %v574_v49, %v573_v33 }
 0x356   :  { %622 = vmatmul.mubr.bf16.vlgmr.msra.gmra.mrb[12].mxu0 %v588_v50  ;;  %665 = vmatmul.mubr.bf16.vlgmr.msra.gmra.mrb[12].mxu1 %v588_v50 }
 0x357   :  { %746 = vmatpush1.bf16.msra.mxu0 %v1844_v1  ;;  %789 = vmatpush1.bf16.msra.mxu1 %v1858_v6  ;;  %v576_v1 = vld [vmem:[#allocation6 + $0x60] sm:$0xff] }
 0x358   :  { %747 = vmatprep.subr.bf16.mxu0 %v1846_v2  ;;  %790 = vmatprep.subr.bf16.mxu1 %v1860_v7  ;;  %v578_v2 = vld [vmem:[#allocation6 + $0x70] sm:$0xff]  ;;  %v581_v6 = vunpack.c.h.bf16 %v576_v1 }
 0x359   :  { %777 = vmatprep.mubr.bf16.mxu0 %v1807_v3  ;;  %820 = vmatprep.mubr.bf16.mxu1 %v1807_v3  ;;  %v584_v7 = vunpack.c.l.bf16 %v578_v2 }
 0x35b   :  { %748 = vmatpush1.bf16.msra.mxu0 %v1855_v5  ;;  %791 = vmatpush1.bf16.msra.mxu1 %v1866_v9  ;;  %v580_v5 = vunpack.c.l.bf16 %v576_v1 }
 0x35c   :  { %749 = vmatprep.subr.bf16.mxu0 %v1862_v8  ;;  %792 = vmatprep.subr.bf16.mxu1 %v1869_v10  ;;  %v585_v10 = vunpack.c.h.bf16 %v578_v2 }
 0x35f   :  { %750 = vmatpush1.bf16.msra.mxu0 %v1872_v11  ;;  %793 = vmatpush1.bf16.msra.mxu1 %v1878_v13 }
 0x360   :  { %751 = vmatprep.subr.bf16.mxu0 %v1874_v12  ;;  %794 = vmatprep.subr.bf16.mxu1 %v1881_v14  ;;  %v577_v12 = vld [vmem:[#allocation6 + $0x68] sm:$0xff] }
 0x363   :  { %752 = vmatpush1.bf16.msra.mxu0 %v1884_v15  ;;  %795 = vmatpush1.bf16.msra.mxu1 %v1890_v17  ;;  %v579_v17 = vld [vmem:[#allocation6 + $0x78] sm:$0xff] }
 0x364   :  { %753 = vmatprep.subr.bf16.mxu0 %v1886_v16  ;;  %796 = vmatprep.subr.bf16.mxu1 %v1893_v18  ;;  %v587_v46 = vunpack.c.h.bf16 %v579_v17 }
 0x367   :  { %754 = vmatpush1.bf16.msra.mxu0 %v1896_v19  ;;  %797 = vmatpush1.bf16.msra.mxu1 %v1902_v21  ;;  %v582_v21 = vunpack.c.l.bf16 %v577_v12 }
 0x368   :  { %755 = vmatprep.subr.bf16.mxu0 %v1898_v20  ;;  %798 = vmatprep.subr.bf16.mxu1 %v1905_v22 }
 0x36b   :  { %756 = vmatpush1.bf16.msra.mxu0 %v1908_v23  ;;  %799 = vmatpush1.bf16.msra.mxu1 %v1914_v25  ;;  %v586_v25 = vunpack.c.l.bf16 %v579_v17  ;;  %v2134_v17 = vld [vmem:[#allocation2 + $0x40] sm:$0xff] }
 0x36c   :  { %757 = vmatprep.subr.bf16.mxu0 %v1910_v24  ;;  %800 = vmatprep.subr.bf16.mxu1 %v1917_v26 }
 0x36f   :  { %758 = vmatpush1.bf16.msra.mxu0 %v1920_v27  ;;  %801 = vmatpush1.bf16.msra.mxu1 %v1926_v29  ;;  %v583_v27 = vunpack.c.h.bf16 %v577_v12  ;;  %v2117_v12 = vld [vmem:[#allocation2 + $0x38] sm:$0xff] }
 0x370   :  { %759 = vmatprep.subr.bf16.mxu0 %v1922_v28  ;;  %802 = vmatprep.subr.bf16.mxu1 %v1929_v30 }
 0x373   :  { %760 = vmatpush1.bf16.msra.mxu0 %v1932_v31  ;;  %803 = vmatpush1.bf16.msra.mxu1 %v1936_v32 }
 0x374   :  { %901 = vmatprep.subr.bf16.mxu0 %v1842_v0  ;;  %944 = vmatprep.subr.bf16.mxu1 %v1851_v4 }
 0x429   :  { %v623_v8 = vpop.f32.mrb[12].mxu0  ;;  %v666_v9 = vpop.f32.mrb[12].mxu1 }
 0x42a   :  { %v675_v11 = vadd.f32 %v623_v8, %v580_v5  ;;  %v625_v13 = vpop.f32.mrb[13].mxu0  ;;  %v668_v14 = vpop.f32.mrb[13].mxu1  ;;  %v677_v28 = vadd.f32 %v666_v9, %v582_v21  ;;  %v2152_v21 = vld [vmem:[#allocation2 + $0x88] sm:$0xff] }
 0x42b   :  { %v676_v15 = vadd.f32 %v625_v13, %v581_v6  ;;  %v627_v16 = vpop.f32.mrb[14].mxu0  ;;  %v670_v18 = vpop.f32.mrb[14].mxu1  ;;  %v678_v48 = vadd.f32 %v668_v14, %v583_v27  ;;  %v2122_v13 = vld [vmem:[#allocation2 + $0x20] sm:$0xff]  ;;  %v2125_v14 = vld [vmem:[#allocation2 + $0x30] sm:$0xff] }
 0x42c   :  { %v1409_v19 = vmul.f32 -1.442695, %v675_v11  ;;  %v679_v0 = vadd.f32 %v627_v16, %v584_v7  ;;  %v629_v20 = vpop.f32.mrb[15].mxu0  ;;  %v672_v4 = vpop.f32.mrb[15].mxu1  ;;  %v681_v36 = vadd.f32 %v670_v18, %v586_v25  ;;  %v1411_v52 = vmul.f32 -1.442695, %v677_v28 }
 0x42d   :  { %v1410_v22 = vmul.f32 -1.442695, %v676_v15  ;;  %v680_v23 = vadd.f32 %v629_v20, %v585_v10  ;;  %v682_v45 = vadd.f32 %v672_v4, %v587_v46  ;;  %v2108_v10 = vld [vmem:[#allocation2] sm:$0xff]  ;;  %v2114_v11 = vld [vmem:[#allocation2 + $0x28] sm:$0xff]  ;;  %v2131_v16 = vld [vmem:[#allocation2 + $0x58] sm:$0xff] }
 0x42e   :  { %1553 = vpow2.f32 %v1409_v19  ;;  %v1412_v24 = vmul.f32 -1.442695, %v679_v0  ;;  %v1414_v54 = vmul.f32 -1.442695, %v681_v36  ;;  %v2128_v15 = vld [vmem:[#allocation2 + $0x48] sm:$0xff]  ;;  %v2137_v18 = vld [vmem:[#allocation2 + $0x50] sm:$0xff] }
 0x42f   :  { %v1413_v26 = vmul.f32 -1.442695, %v680_v23  ;;  %1555 = vpow2.f32 %v1410_v22  ;;  %v2140_v19 = vld [vmem:[#allocation2 + $0x68] sm:$0xff]  ;;  %v2143_v0 = vld [vmem:[#allocation2 + $0x78] sm:$0xff]  ;;  %v2146_v20 = vld [vmem:[#allocation2 + $0x60] sm:$0xff] }
 0x430   :  { %1557 = vpow2.f32 %v1412_v24  ;;  %v2149_v4 = vld [vmem:[#allocation2 + $0x70] sm:$0xff]  ;;  %v2155_v22 = vld [vmem:[#allocation2 + $0x98] sm:$0xff]  ;;  %v2158_v23 = vld [vmem:[#allocation2 + $0x80] sm:$0xff] }
 0x431   :  { %1559 = vpow2.f32 %v1413_v26  ;;  %v2161_v24 = vld [vmem:[#allocation2 + $0x90] sm:$0xff]  ;;  %v2164_v25 = vld [vmem:[#allocation2 + $0xa8] sm:$0xff]  ;;  %v2167_v26 = vld [vmem:[#allocation2 + $0xb8] sm:$0xff] }
 0x432   :  { %1561 = vtanh.f32 %v678_v48  ;;  %v2170_v27 = vld [vmem:[#allocation2 + $0xa0] sm:$0xff]  ;;  %v2173_v28 = vld [vmem:[#allocation2 + $0xb0] sm:$0xff]  ;;  %v2176_v36 = vld [vmem:[#allocation2 + $0xc8] sm:$0xff] }
 0x433   :  { %1563 = vpow2.f32 %v1411_v52  ;;  %v2179_v48 = vld [vmem:[#allocation2 + $0xd8] sm:$0xff]  ;;  %v2182_v46 = vld [vmem:[#allocation2 + $0xc0] sm:$0xff]  ;;  %v2186_v52 = vld [vmem:[#allocation2 + $0xe8] sm:$0xff] }
 0x434   :  { %1565 = vpow2.f32 %v1414_v54  ;;  %v2192_v54 = vld [vmem:[#allocation2 + $0x8] sm:$0xff] }
 0x438   :  { %v1554_v55 = vpop.eup %1553 }
 0x439   :  { %v701_v51 = vadd.f32 1.0, %v1554_v55  ;;  %v1556_v53 = vpop.eup %1555  ;;  %v2195_v55 = vld [vmem:[#allocation2 + $0x18] sm:$0xff] }
 0x43a   :  { %v1558_v56 = vpop.eup %1557  ;;  %v702_v57 = vadd.f32 1.0, %v1556_v53 }
 0x43b   :  { %1567 = vrcp.f32 %v701_v51  ;;  %v704_v58 = vadd.f32 1.0, %v1558_v56  ;;  %v1560_v61 = vpop.eup %1559 }
 0x43c   :  { %1569 = vtanh.f32 %v682_v45  ;;  %v705_v62 = vadd.f32 1.0, %v1560_v61  ;;  %v1562_v63 = vpop.eup %1561  ;;  %v732_v45 = vld [vmem:[#allocation6 + $0x80] sm:$0xff] }
 0x43d   :  { %1571 = vrcp.f32 %v702_v57  ;;  %v1564_v34 = vpop.eup %1563  ;;  %v736_v51 = vunpack.c.l.bf16 %v732_v45  ;;  %v737_v53 = vunpack.c.h.bf16 %v732_v45 }
 0x43e   :  { %1573 = vrcp.f32 %v704_v58  ;;  %v1566_v35 = vpop.eup %1565  ;;  %v703_v60 = vadd.f32 1.0, %v1564_v34 }
 0x43f   :  { %1575 = vrcp.f32 %v705_v62  ;;  %v706_v49 = vadd.f32 1.0, %v1566_v35  ;;  %v735_v35 = vld [vmem:[#allocation6 + $0x98] sm:$0xff] }
 0x440   :  { %1577 = vrcp.f32 %v703_v60 }
 0x445   :  { %v1568_v37 = vpop.eup %1567 }
 0x446   :  { %v1570_v38 = vpop.eup %1569  ;;  %v723_v40 = vmul.f32 %v1568_v37, %v1562_v63 }
 0x447   :  { %v1572_v59 = vpop.eup %1571 }
 0x448   :  { %v1574_v42 = vpop.eup %1573  ;;  %v721_v44 = vmul.f32 %v1572_v59, %v2059_v41 }
 0x449   :  { %v724_v39 = vmul.f32 %v1574_v42, %v1570_v38  ;;  %v1576_v47 = vpop.eup %1575 }
 0x44a   :  { %v2101_v33 = vadd.f32 %v723_v40, %v721_v44  ;;  %v722_v50 = vmul.f32 %v1576_v47, %v2063_v43  ;;  %v1578_v2 = vpop.eup %1577  ;;  %v2111_v43 = vld [vmem:[#allocation2 + $0x10] sm:$0xff] }
 0x44c   :  { %1579 = vtanh.f32 %v2101_v33  ;;  %v2105_v1 = vadd.f32 %v724_v39, %v722_v50 }
 0x44d   :  { %1581 = vrcp.f32 %v706_v49  ;;  %v742_v49 = vunpack.c.l.bf16 %v735_v35 }
 0x44e   :  { %1583 = vtanh.f32 %v2105_v1 }
 0x456   :  { %v1580_v5 = vpop.eup %1579 }
 0x457   :  { %v1582_v6 = vpop.eup %1581  ;;  %v729_v41 = vmul.f32 %v1580_v5, %v1578_v2 }
 0x458   :  { %v1584_v7 = vpop.eup %1583 }
 0x459   :  { %v730_v8 = vmul.f32 %v1584_v7, %v1582_v6 }
 0x45b   :  { %v744_v9 = vpack.c.bf16 %v730_v8, %v729_v41  ;;  %v743_v41 = vunpack.c.h.bf16 %v735_v35 }
 0x45d   :  { %778 = vmatmul.mubr.bf16.vlgmr.msra.gmra.mrb[16].mxu0 %v744_v9  ;;  %821 = vmatmul.mubr.bf16.vlgmr.msra.gmra.mrb[16].mxu1 %v744_v9 }
 0x45e   :  { %902 = vmatpush1.bf16.msra.mxu0 %v2108_v10  ;;  %945 = vmatpush1.bf16.msra.mxu1 %v2111_v43 }
 0x45f   :  { %903 = vmatprep.subr.bf16.mxu0 %v2114_v11  ;;  %946 = vmatprep.subr.bf16.mxu1 %v2117_v12 }
 0x460   :  { %933 = vmatprep.mubr.bf16.mxu0 %v1807_v3  ;;  %976 = vmatprep.mubr.bf16.mxu1 %v1807_v3 }
 0x462   :  { %904 = vmatpush1.bf16.msra.mxu0 %v2122_v13  ;;  %947 = vmatpush1.bf16.msra.mxu1 %v2125_v14 }
 0x463   :  { %905 = vmatprep.subr.bf16.mxu0 %v2128_v15  ;;  %948 = vmatprep.subr.bf16.mxu1 %v2131_v16 }
 0x466   :  { %906 = vmatpush1.bf16.msra.mxu0 %v2134_v17  ;;  %949 = vmatpush1.bf16.msra.mxu1 %v2137_v18 }
 0x467   :  { %907 = vmatprep.subr.bf16.mxu0 %v2140_v19  ;;  %950 = vmatprep.subr.bf16.mxu1 %v2143_v0 }
 0x46a   :  { %908 = vmatpush1.bf16.msra.mxu0 %v2146_v20  ;;  %951 = vmatpush1.bf16.msra.mxu1 %v2149_v4 }
 0x46b   :  { %909 = vmatprep.subr.bf16.mxu0 %v2152_v21  ;;  %952 = vmatprep.subr.bf16.mxu1 %v2155_v22 }
 0x46e   :  { %910 = vmatpush1.bf16.msra.mxu0 %v2158_v23  ;;  %953 = vmatpush1.bf16.msra.mxu1 %v2161_v24 }
 0x46f   :  { %911 = vmatprep.subr.bf16.mxu0 %v2164_v25  ;;  %954 = vmatprep.subr.bf16.mxu1 %v2167_v26 }
 0x472   :  { %912 = vmatpush1.bf16.msra.mxu0 %v2170_v27  ;;  %955 = vmatpush1.bf16.msra.mxu1 %v2173_v28 }
 0x473   :  { %913 = vmatprep.subr.bf16.mxu0 %v2176_v36  ;;  %956 = vmatprep.subr.bf16.mxu1 %v2179_v48 }
 0x476   :  { %914 = vmatpush1.bf16.msra.mxu0 %v2182_v46  ;;  %957 = vmatpush1.bf16.msra.mxu1 %v1926_v29  ;;  %v734_v29 = vld [vmem:[#allocation6 + $0x90] sm:$0xff] }
 0x477   :  { %915 = vmatprep.subr.bf16.mxu0 %v2186_v52  ;;  %958 = vmatprep.subr.bf16.mxu1 %v1929_v30  ;;  %v740_v56 = vunpack.c.l.bf16 %v734_v29  ;;  %v741_v30 = vunpack.c.h.bf16 %v734_v29 }
 0x47a   :  { %916 = vmatpush1.bf16.msra.mxu0 %v1932_v31  ;;  %959 = vmatpush1.bf16.msra.mxu1 %v1936_v32  ;;  %v733_v31 = vld [vmem:[#allocation6 + $0x88] sm:$0xff] }
 0x47b   :  { %1057 = vmatprep.subr.bf16.mxu0 %v2192_v54  ;;  %1100 = vmatprep.subr.bf16.mxu1 %v2195_v55  ;;  %v738_v60 = vunpack.c.l.bf16 %v733_v31  ;;  %v739_v2 = vunpack.c.h.bf16 %v733_v31 }
 0x530   :  { %v779_v57 = vpop.f32.mrb[16].mxu0  ;;  %v822_v58 = vpop.f32.mrb[16].mxu1 }
 0x531   :  { %v831_v61 = vadd.f32 %v779_v57, %v736_v51  ;;  %v781_v62 = vpop.f32.mrb[17].mxu0  ;;  %v824_v32 = vpop.f32.mrb[17].mxu1  ;;  %v833_v5 = vadd.f32 %v822_v58, %v738_v60 }
 0x532   :  { %v832_v63 = vadd.f32 %v781_v62, %v737_v53  ;;  %v783_v34 = vpop.f32.mrb[18].mxu0  ;;  %v826_v37 = vpop.f32.mrb[18].mxu1  ;;  %v834_v7 = vadd.f32 %v824_v32, %v739_v2 }
 0x533   :  { %v1415_v38 = vmul.f32 -1.442695, %v831_v61  ;;  %v835_v40 = vadd.f32 %v783_v34, %v740_v56  ;;  %v785_v59 = vpop.f32.mrb[19].mxu0  ;;  %v828_v42 = vpop.f32.mrb[19].mxu1  ;;  %v837_v6 = vadd.f32 %v826_v37, %v742_v49  ;;  %v1417_v8 = vmul.f32 -1.442695, %v833_v5 }
 0x534   :  { %v1416_v44 = vmul.f32 -1.442695, %v832_v63  ;;  %v836_v39 = vadd.f32 %v785_v59, %v741_v30  ;;  %v838_v29 = vadd.f32 %v828_v42, %v743_v41 }
 0x535   :  { %1585 = vpow2.f32 %v1415_v38  ;;  %v1418_v47 = vmul.f32 -1.442695, %v835_v40  ;;  %v1420_v9 = vmul.f32 -1.442695, %v837_v6 }
 0x536   :  { %v1419_v50 = vmul.f32 -1.442695, %v836_v39  ;;  %1587 = vpow2.f32 %v1416_v44 }
 0x537   :  { %1589 = vpow2.f32 %v1418_v47 }
 0x538   :  { %1591 = vpow2.f32 %v1419_v50 }
 0x539   :  { %1593 = vtanh.f32 %v834_v7 }
 0x53a   :  { %1595 = vpow2.f32 %v1417_v8  ;;  %v2237_v8 = vld [vmem:[#allocation2 + $0xf8] sm:$0xff] }
 0x53b   :  { %1597 = vpow2.f32 %v1420_v9  ;;  %v2240_v9 = vld [vmem:[#allocation2 + $0xe0] sm:$0xff] }
 0x53f   :  { %v1586_v45 = vpop.eup %1585 }
 0x540   :  { %v857_v51 = vadd.f32 1.0, %v1586_v45  ;;  %v1588_v53 = vpop.eup %1587  ;;  %v2243_v45 = vld [vmem:[#allocation2 + $0xf0] sm:$0xff] }
 0x541   :  { %v1590_v56 = vpop.eup %1589  ;;  %v858_v57 = vadd.f32 1.0, %v1588_v53 }
 0x542   :  { %1599 = vrcp.f32 %v857_v51  ;;  %v860_v30 = vadd.f32 1.0, %v1590_v56  ;;  %v1592_v58 = vpop.eup %1591  ;;  %v890_v51 = vld [vmem:[#allocation6 + $0xb0] sm:$0xff] }
 0x543   :  { %1601 = vtanh.f32 %v838_v29  ;;  %v861_v61 = vadd.f32 1.0, %v1592_v58  ;;  %v1594_v31 = vpop.eup %1593  ;;  %v888_v29 = vld [vmem:[#allocation6 + $0xa0] sm:$0xff] }
 0x544   :  { %1603 = vrcp.f32 %v858_v57  ;;  %v1596_v62 = vpop.eup %1595  ;;  %v892_v53 = vunpack.c.l.bf16 %v888_v29  ;;  %v893_v56 = vunpack.c.h.bf16 %v888_v29  ;;  %v896_v57 = vunpack.c.l.bf16 %v890_v51 }
 0x545   :  { %1605 = vrcp.f32 %v860_v30  ;;  %v1598_v32 = vpop.eup %1597  ;;  %v859_v40 = vadd.f32 1.0, %v1596_v62  ;;  %v889_v62 = vld [vmem:[#allocation6 + $0xa8] sm:$0xff] }
 0x546   :  { %1607 = vrcp.f32 %v861_v61  ;;  %v862_v39 = vadd.f32 1.0, %v1598_v32  ;;  %v897_v61 = vunpack.c.h.bf16 %v890_v51 }
 0x547   :  { %1609 = vrcp.f32 %v859_v40 }
 0x54c   :  { %v1600_v63 = vpop.eup %1599 }
 0x54d   :  { %v1602_v34 = vpop.eup %1601  ;;  %v879_v35 = vmul.f32 %v1600_v63, %v1594_v31 }
 0x54e   :  { %v1604_v37 = vpop.eup %1603 }
 0x54f   :  { %v1606_v38 = vpop.eup %1605  ;;  %v877_v59 = vmul.f32 %v1604_v37, %v2101_v33  ;;  %v891_v37 = vld [vmem:[#allocation6 + $0xb8] sm:$0xff] }
 0x550   :  { %v880_v42 = vmul.f32 %v1606_v38, %v1602_v34  ;;  %v1608_v60 = vpop.eup %1607 }
 0x551   :  { %v2199_v44 = vadd.f32 %v879_v35, %v877_v59  ;;  %v878_v47 = vmul.f32 %v1608_v60, %v2105_v1  ;;  %v1610_v50 = vpop.eup %1609  ;;  %v2233_v1 = vld [vmem:[#allocation2 + $0xd0] sm:$0xff] }
 0x553   :  { %1611 = vtanh.f32 %v2199_v44  ;;  %v2203_v49 = vadd.f32 %v880_v42, %v878_v47  ;;  %v894_v42 = vunpack.c.l.bf16 %v889_v62 }
 0x554   :  { %1613 = vrcp.f32 %v862_v39 }
 0x555   :  { %1615 = vtanh.f32 %v2203_v49 }
 0x55d   :  { %v1612_v2 = vpop.eup %1611 }
 0x55e   :  { %v1614_v5 = vpop.eup %1613  ;;  %v885_v33 = vmul.f32 %v1612_v2, %v1610_v50  ;;  %v898_v50 = vunpack.c.l.bf16 %v891_v37 }
 0x55f   :  { %v1616_v6 = vpop.eup %1615 }
 0x560   :  { %v886_v7 = vmul.f32 %v1616_v6, %v1614_v5  ;;  %v895_v5 = vunpack.c.h.bf16 %v889_v62 }
 0x562   :  { %v900_v41 = vpack.c.bf16 %v886_v7, %v885_v33 }
 0x564   :  { %934 = vmatmul.mubr.bf16.vlgmr.msra.gmra.mrb[20].mxu0 %v900_v41  ;;  %977 = vmatmul.mubr.bf16.vlgmr.msra.gmra.mrb[20].mxu1 %v900_v41  ;;  %v899_v41 = vunpack.c.h.bf16 %v891_v37 }
 0x565   :  { %1058 = vmatpush1.bf16.msra.mxu0 %v2108_v10  ;;  %1101 = vmatpush1.bf16.msra.mxu1 %v2111_v43 }
 0x566   :  { %1059 = vmatprep.subr.bf16.mxu0 %v2114_v11  ;;  %1102 = vmatprep.subr.bf16.mxu1 %v2117_v12 }
 0x567   :  { %1089 = vmatprep.mubr.bf16.mxu0 %v1807_v3  ;;  %1132 = vmatprep.mubr.bf16.mxu1 %v1807_v3 }
 0x569   :  { %1060 = vmatpush1.bf16.msra.mxu0 %v2122_v13  ;;  %1103 = vmatpush1.bf16.msra.mxu1 %v2125_v14 }
 0x56a   :  { %1061 = vmatprep.subr.bf16.mxu0 %v2128_v15  ;;  %1104 = vmatprep.subr.bf16.mxu1 %v2131_v16 }
 0x56d   :  { %1062 = vmatpush1.bf16.msra.mxu0 %v2134_v17  ;;  %1105 = vmatpush1.bf16.msra.mxu1 %v2137_v18 }
 0x56e   :  { %1063 = vmatprep.subr.bf16.mxu0 %v2140_v19  ;;  %1106 = vmatprep.subr.bf16.mxu1 %v2143_v0 }
 0x571   :  { %1064 = vmatpush1.bf16.msra.mxu0 %v2146_v20  ;;  %1107 = vmatpush1.bf16.msra.mxu1 %v2149_v4 }
 0x572   :  { %1065 = vmatprep.subr.bf16.mxu0 %v2152_v21  ;;  %1108 = vmatprep.subr.bf16.mxu1 %v2155_v22 }
 0x575   :  { %1066 = vmatpush1.bf16.msra.mxu0 %v2158_v23  ;;  %1109 = vmatpush1.bf16.msra.mxu1 %v2161_v24 }
 0x576   :  { %1067 = vmatprep.subr.bf16.mxu0 %v2164_v25  ;;  %1110 = vmatprep.subr.bf16.mxu1 %v2167_v26 }
 0x579   :  { %1068 = vmatpush1.bf16.msra.mxu0 %v2170_v27  ;;  %1111 = vmatpush1.bf16.msra.mxu1 %v2173_v28 }
 0x57a   :  { %1069 = vmatprep.subr.bf16.mxu0 %v2176_v36  ;;  %1112 = vmatprep.subr.bf16.mxu1 %v2179_v48 }
 0x57d   :  { %1070 = vmatpush1.bf16.msra.mxu0 %v2182_v46  ;;  %1113 = vmatpush1.bf16.msra.mxu1 %v2233_v1 }
 0x57e   :  { %1071 = vmatprep.subr.bf16.mxu0 %v2186_v52  ;;  %1114 = vmatprep.subr.bf16.mxu1 %v2237_v8 }
 0x581   :  { %1072 = vmatpush1.bf16.msra.mxu0 %v2240_v9  ;;  %1115 = vmatpush1.bf16.msra.mxu1 %v2243_v45 }
 0x582   :  { %1213 = vmatprep.subr.bf16.mxu0 %v2192_v54  ;;  %1256 = vmatprep.subr.bf16.mxu1 %v2195_v55 }
 0x637   :  { %v935_v30 = vpop.f32.mrb[20].mxu0  ;;  %v978_v58 = vpop.f32.mrb[20].mxu1 }
 0x638   :  { %v987_v31 = vadd.f32 %v935_v30, %v892_v53  ;;  %v937_v32 = vpop.f32.mrb[21].mxu0  ;;  %v980_v63 = vpop.f32.mrb[21].mxu1  ;;  %v989_v6 = vadd.f32 %v978_v58, %v894_v42 }
 0x639   :  { %v988_v34 = vadd.f32 %v937_v32, %v893_v56  ;;  %v939_v35 = vpop.f32.mrb[22].mxu0  ;;  %v982_v38 = vpop.f32.mrb[22].mxu1  ;;  %v990_v7 = vadd.f32 %v980_v63, %v895_v5 }
 0x63a   :  { %v1421_v40 = vmul.f32 -1.442695, %v987_v31  ;;  %v991_v54 = vadd.f32 %v939_v35, %v896_v57  ;;  %v941_v59 = vpop.f32.mrb[23].mxu0  ;;  %v984_v55 = vpop.f32.mrb[23].mxu1  ;;  %v993_v33 = vadd.f32 %v982_v38, %v898_v50  ;;  %v1423_v29 = vmul.f32 -1.442695, %v989_v6 }
 0x63b   :  { %v1422_v60 = vmul.f32 -1.442695, %v988_v34  ;;  %v992_v39 = vadd.f32 %v941_v59, %v897_v61  ;;  %v994_v56 = vadd.f32 %v984_v55, %v899_v41 }
 0x63c   :  { %1617 = vpow2.f32 %v1421_v40  ;;  %v1424_v47 = vmul.f32 -1.442695, %v991_v54  ;;  %v1426_v51 = vmul.f32 -1.442695, %v993_v33 }
 0x63d   :  { %v1425_v2 = vmul.f32 -1.442695, %v992_v39  ;;  %1619 = vpow2.f32 %v1422_v60 }
 0x63e   :  { %1621 = vpow2.f32 %v1424_v47 }
 0x63f   :  { %1623 = vpow2.f32 %v1425_v2 }
 0x640   :  { %1625 = vtanh.f32 %v990_v7 }
 0x641   :  { %1627 = vpow2.f32 %v1423_v29 }
 0x642   :  { %1629 = vpow2.f32 %v1426_v51 }
 0x646   :  { %v1618_v53 = vpop.eup %1617 }
 0x647   :  { %v1013_v57 = vadd.f32 1.0, %v1618_v53  ;;  %v1620_v30 = vpop.eup %1619 }
 0x648   :  { %v1622_v61 = vpop.eup %1621  ;;  %v1014_v31 = vadd.f32 1.0, %v1620_v30 }
 0x649   :  { %1631 = vrcp.f32 %v1013_v57  ;;  %v1016_v32 = vadd.f32 1.0, %v1622_v61  ;;  %v1624_v58 = vpop.eup %1623 }
 0x64a   :  { %1633 = vtanh.f32 %v994_v56  ;;  %v1017_v62 = vadd.f32 1.0, %v1624_v58  ;;  %v1626_v63 = vpop.eup %1625 }
 0x64b   :  { %1635 = vrcp.f32 %v1014_v31  ;;  %v1628_v34 = vpop.eup %1627 }
 0x64c   :  { %1637 = vrcp.f32 %v1016_v32  ;;  %v1630_v35 = vpop.eup %1629  ;;  %v1015_v55 = vadd.f32 1.0, %v1628_v34 }
 0x64d   :  { %1639 = vrcp.f32 %v1017_v62  ;;  %v1018_v50 = vadd.f32 1.0, %v1630_v35 }
 0x64e   :  { %1641 = vrcp.f32 %v1015_v55 }
 0x653   :  { %v1632_v37 = vpop.eup %1631 }
 0x654   :  { %v1634_v38 = vpop.eup %1633  ;;  %v1035_v40 = vmul.f32 %v1632_v37, %v1626_v63 }
 0x655   :  { %v1636_v54 = vpop.eup %1635 }
 0x656   :  { %v1638_v59 = vpop.eup %1637  ;;  %v1033_v42 = vmul.f32 %v1636_v54, %v2199_v44 }
 0x657   :  { %v1036_v60 = vmul.f32 %v1638_v59, %v1634_v38  ;;  %v1640_v39 = vpop.eup %1639 }
 0x658   :  { %v2249_v47 = vadd.f32 %v1035_v40, %v1033_v42  ;;  %v1034_v2 = vmul.f32 %v1640_v39, %v2203_v49  ;;  %v1642_v6 = vpop.eup %1641 }
 0x65a   :  { %1643 = vtanh.f32 %v2249_v47  ;;  %v2253_v5 = vadd.f32 %v1036_v60, %v1034_v2 }
 0x65b   :  { %1645 = vrcp.f32 %v1018_v50 }
 0x65c   :  { %1647 = vtanh.f32 %v2253_v5 }
 0x664   :  { %v1644_v33 = vpop.eup %1643 }
 0x665   :  { %v1646_v7 = vpop.eup %1645  ;;  %v1041_v44 = vmul.f32 %v1644_v33, %v1642_v6 }
 0x666   :  { %v1648_v41 = vpop.eup %1647 }
 0x667   :  { %v1042_v29 = vmul.f32 %v1648_v41, %v1646_v7 }
 0x669   :  { %v1056_v51 = vpack.c.bf16 %v1042_v29, %v1041_v44 }
 0x66b   :  { %1090 = vmatmul.mubr.bf16.vlgmr.msra.gmra.mrb[24].mxu0 %v1056_v51  ;;  %1133 = vmatmul.mubr.bf16.vlgmr.msra.gmra.mrb[24].mxu1 %v1056_v51 }
 0x66c   :  { %1214 = vmatpush1.bf16.msra.mxu0 %v2108_v10  ;;  %1257 = vmatpush1.bf16.msra.mxu1 %v2111_v43  ;;  %v1046_v10 = vld [vmem:[#allocation6 + $0xd0] sm:$0xff] }
 0x66d   :  { %1215 = vmatprep.subr.bf16.mxu0 %v2114_v11  ;;  %1258 = vmatprep.subr.bf16.mxu1 %v2117_v12  ;;  %v1052_v12 = vunpack.c.l.bf16 %v1046_v10 }
 0x66e   :  { %1245 = vmatprep.mubr.bf16.mxu0 %v1807_v3  ;;  %1288 = vmatprep.mubr.bf16.mxu1 %v1807_v3  ;;  %v1044_v3 = vld [vmem:[#allocation6 + $0xc0] sm:$0xff] }
 0x66f   :  { %v1048_v43 = vunpack.c.l.bf16 %v1044_v3  ;;  %v1049_v11 = vunpack.c.h.bf16 %v1044_v3 }
 0x670   :  { %1216 = vmatpush1.bf16.msra.mxu0 %v2122_v13  ;;  %1259 = vmatpush1.bf16.msra.mxu1 %v2125_v14 }
 0x671   :  { %1217 = vmatprep.subr.bf16.mxu0 %v2128_v15  ;;  %1260 = vmatprep.subr.bf16.mxu1 %v2131_v16  ;;  %v1053_v15 = vunpack.c.h.bf16 %v1046_v10 }
 0x674   :  { %1218 = vmatpush1.bf16.msra.mxu0 %v2134_v17  ;;  %1261 = vmatpush1.bf16.msra.mxu1 %v2137_v18  ;;  %v1045_v17 = vld [vmem:[#allocation6 + $0xc8] sm:$0xff] }
 0x675   :  { %1219 = vmatprep.subr.bf16.mxu0 %v2140_v19  ;;  %1262 = vmatprep.subr.bf16.mxu1 %v2143_v0 }
 0x678   :  { %1220 = vmatpush1.bf16.msra.mxu0 %v2146_v20  ;;  %1263 = vmatpush1.bf16.msra.mxu1 %v2149_v4  ;;  %v1047_v4 = vld [vmem:[#allocation6 + $0xd8] sm:$0xff] }
 0x679   :  { %1221 = vmatprep.subr.bf16.mxu0 %v2152_v21  ;;  %1264 = vmatprep.subr.bf16.mxu1 %v2155_v22 }
 0x67c   :  { %1222 = vmatpush1.bf16.msra.mxu0 %v2158_v23  ;;  %1265 = vmatpush1.bf16.msra.mxu1 %v2161_v24 }
 0x67d   :  { %1223 = vmatprep.subr.bf16.mxu0 %v2164_v25  ;;  %1266 = vmatprep.subr.bf16.mxu1 %v2167_v26  ;;  %v1050_v26 = vunpack.c.l.bf16 %v1045_v17 }
 0x680   :  { %1224 = vmatpush1.bf16.msra.mxu0 %v2170_v27  ;;  %1267 = vmatpush1.bf16.msra.mxu1 %v2173_v28 }
 0x681   :  { %1225 = vmatprep.subr.bf16.mxu0 %v2176_v36  ;;  %1268 = vmatprep.subr.bf16.mxu1 %v2179_v48  ;;  %v1054_v48 = vunpack.c.l.bf16 %v1047_v4 }
 0x684   :  { %1226 = vmatpush1.bf16.msra.mxu0 %v2182_v46  ;;  %1269 = vmatpush1.bf16.msra.mxu1 %v2233_v1 }
 0x685   :  { %1227 = vmatprep.subr.bf16.mxu0 %v2186_v52  ;;  %1270 = vmatprep.subr.bf16.mxu1 %v2237_v8  ;;  %v1051_v52 = vunpack.c.h.bf16 %v1045_v17 }
 0x688   :  { %1228 = vmatpush1.bf16.msra.mxu0 %v2240_v9  ;;  %1271 = vmatpush1.bf16.msra.mxu1 %v2243_v45  ;;  %v1055_v9 = vunpack.c.h.bf16 %v1047_v4 }
 0x73e   :  { %v1091_v13 = vpop.f32.mrb[24].mxu0  ;;  %v1134_v14 = vpop.f32.mrb[24].mxu1 }
 0x73f   :  { %v1143_v16 = vadd.f32 %v1091_v13, %v1048_v43  ;;  %v1093_v18 = vpop.f32.mrb[25].mxu0  ;;  %v1136_v19 = vpop.f32.mrb[25].mxu1  ;;  %v1145_v49 = vadd.f32 %v1134_v14, %v1050_v26  ;;  %v1200_v43 = vld [vmem:[#allocation6 + $0xe0] sm:$0xff] }
 0x740   :  { %v1144_v0 = vadd.f32 %v1093_v18, %v1049_v11  ;;  %v1095_v20 = vpop.f32.mrb[26].mxu0  ;;  %v1138_v21 = vpop.f32.mrb[26].mxu1  ;;  %v1146_v8 = vadd.f32 %v1136_v19, %v1051_v52  ;;  %v1202_v11 = vld [vmem:[#allocation6 + $0xf0] sm:$0xff]  ;;  %v1201_v18 = vld [vmem:[#allocation6 + $0xe8] sm:$0xff] }
 0x741   :  { %v1427_v22 = vmul.f32 -1.442695, %v1143_v16  ;;  %v1147_v23 = vadd.f32 %v1095_v20, %v1052_v12  ;;  %v1097_v24 = vpop.f32.mrb[27].mxu0  ;;  %v1140_v25 = vpop.f32.mrb[27].mxu1  ;;  %v1149_v1 = vadd.f32 %v1138_v21, %v1054_v48  ;;  %v1429_v45 = vmul.f32 -1.442695, %v1145_v49 }
 0x742   :  { %v1428_v27 = vmul.f32 -1.442695, %v1144_v0  ;;  %v1148_v28 = vadd.f32 %v1097_v24, %v1053_v15  ;;  %v1150_v57 = vadd.f32 %v1140_v25, %v1055_v9  ;;  %v1205_v12 = vunpack.c.h.bf16 %v1200_v43  ;;  %v1203_v21 = vld [vmem:[#allocation6 + $0xf8] sm:$0xff] }
 0x743   :  { %1649 = vpow2.f32 %v1427_v22  ;;  %v1430_v36 = vmul.f32 -1.442695, %v1147_v23  ;;  %v1432_v53 = vmul.f32 -1.442695, %v1149_v1  ;;  %v1208_v13 = vunpack.c.l.bf16 %v1202_v11 }
 0x744   :  { %v1431_v46 = vmul.f32 -1.442695, %v1148_v28  ;;  %1651 = vpow2.f32 %v1428_v27  ;;  %v1209_v16 = vunpack.c.h.bf16 %v1202_v11  ;;  %v1206_v27 = vunpack.c.l.bf16 %v1201_v18 }
 0x745   :  { %1653 = vpow2.f32 %v1430_v36  ;;  %v1207_v49 = vunpack.c.h.bf16 %v1201_v18 }
 0x746   :  { %1655 = vpow2.f32 %v1431_v46  ;;  %v1210_v46 = vunpack.c.l.bf16 %v1203_v21 }
 0x747   :  { %1657 = vtanh.f32 %v1146_v8 }
 0x748   :  { %1659 = vpow2.f32 %v1429_v45  ;;  %v1211_v45 = vunpack.c.h.bf16 %v1203_v21 }
 0x749   :  { %1661 = vpow2.f32 %v1432_v53 }
 0x74d   :  { %v1650_v56 = vpop.eup %1649 }
 0x74e   :  { %v1169_v30 = vadd.f32 1.0, %v1650_v56  ;;  %v1652_v61 = vpop.eup %1651 }
 0x74f   :  { %v1654_v31 = vpop.eup %1653  ;;  %v1170_v32 = vadd.f32 1.0, %v1652_v61 }
 0x750   :  { %1663 = vrcp.f32 %v1169_v30  ;;  %v1172_v58 = vadd.f32 1.0, %v1654_v31  ;;  %v1656_v62 = vpop.eup %1655 }
 0x751   :  { %1665 = vtanh.f32 %v1150_v57  ;;  %v1173_v63 = vadd.f32 1.0, %v1656_v62  ;;  %v1658_v34 = vpop.eup %1657 }
 0x752   :  { %1667 = vrcp.f32 %v1170_v32  ;;  %v1660_v35 = vpop.eup %1659 }
 0x753   :  { %1669 = vrcp.f32 %v1172_v58  ;;  %v1662_v37 = vpop.eup %1661  ;;  %v1171_v42 = vadd.f32 1.0, %v1660_v35 }
 0x754   :  { %1671 = vrcp.f32 %v1173_v63  ;;  %v1174_v6 = vadd.f32 1.0, %v1662_v37 }
 0x755   :  { %1673 = vrcp.f32 %v1171_v42 }
 0x75a   :  { %v1664_v38 = vpop.eup %1663 }
 0x75b   :  { %v1666_v40 = vpop.eup %1665  ;;  %v1191_v54 = vmul.f32 %v1664_v38, %v1658_v34 }
 0x75c   :  { %v1668_v59 = vpop.eup %1667 }
 0x75d   :  { %v1670_v55 = vpop.eup %1669  ;;  %v1189_v60 = vmul.f32 %v1668_v59, %v2249_v47 }
 0x75e   :  { %v1192_v39 = vmul.f32 %v1670_v55, %v1666_v40  ;;  %v1672_v50 = vpop.eup %1671 }
 0x75f   :  { %v2289_v2 = vadd.f32 %v1191_v54, %v1189_v60  ;;  %v1190_v33 = vmul.f32 %v1672_v50, %v2253_v5  ;;  %v1674_v41 = vpop.eup %1673  ;;  %v1204_v5 = vunpack.c.l.bf16 %v1200_v43 }
 0x761   :  { %1675 = vtanh.f32 %v2289_v2  ;;  %v2293_v7 = vadd.f32 %v1192_v39, %v1190_v33 }
 0x762   :  { %1677 = vrcp.f32 %v1174_v6 }
 0x763   :  { %1679 = vtanh.f32 %v2293_v7 }
 0x76b   :  { %v1676_v44 = vpop.eup %1675 }
 0x76c   :  { %v1678_v29 = vpop.eup %1677  ;;  %v1197_v47 = vmul.f32 %v1676_v44, %v1674_v41 }
 0x76d   :  { %v1680_v51 = vpop.eup %1679 }
 0x76e   :  { %v1198_v3 = vmul.f32 %v1680_v51, %v1678_v29 }
 0x770   :  { %v1212_v10 = vpack.c.bf16 %v1198_v3, %v1197_v47 }
 0x772   :  { %1246 = vmatmul.mubr.bf16.vlgmr.msra.gmra.mrb[28].mxu0 %v1212_v10  ;;  %1289 = vmatmul.mubr.bf16.vlgmr.msra.gmra.mrb[28].mxu1 %v1212_v10 }
 0x845   :  { %v1247_v14 = vpop.f32.mrb[28].mxu0  ;;  %v1290_v15 = vpop.f32.mrb[28].mxu1 }
 0x846   :  { %v1299_v17 = vadd.f32 %v1247_v14, %v1204_v5  ;;  %v1249_v19 = vpop.f32.mrb[29].mxu0  ;;  %v1292_v0 = vpop.f32.mrb[29].mxu1  ;;  %v1301_v1 = vadd.f32 %v1290_v15, %v1206_v27 }
 0x847   :  { %v1300_v20 = vadd.f32 %v1249_v19, %v1205_v12  ;;  %v1251_v4 = vpop.f32.mrb[30].mxu0  ;;  %v1294_v22 = vpop.f32.mrb[30].mxu1  ;;  %v1302_v9 = vadd.f32 %v1292_v0, %v1207_v49 }
 0x848   :  { %v1433_v23 = vmul.f32 -1.442695, %v1299_v17  ;;  %v1303_v24 = vadd.f32 %v1251_v4, %v1208_v13  ;;  %v1253_v25 = vpop.f32.mrb[31].mxu0  ;;  %v1296_v26 = vpop.f32.mrb[31].mxu1  ;;  %v1305_v8 = vadd.f32 %v1294_v22, %v1210_v46  ;;  %v1435_v53 = vmul.f32 -1.442695, %v1301_v1 }
 0x849   :  { %v1434_v28 = vmul.f32 -1.442695, %v1300_v20  ;;  %v1304_v36 = vadd.f32 %v1253_v25, %v1209_v16  ;;  %v1306_v30 = vadd.f32 %v1296_v26, %v1211_v45 }
 0x84a   :  { %1681 = vpow2.f32 %v1433_v23  ;;  %v1436_v48 = vmul.f32 -1.442695, %v1303_v24  ;;  %v1438_v56 = vmul.f32 -1.442695, %v1305_v8 }
 0x84b   :  { %v1437_v52 = vmul.f32 -1.442695, %v1304_v36  ;;  %1683 = vpow2.f32 %v1434_v28 }
 0x84c   :  { %1685 = vpow2.f32 %v1436_v48 }
 0x84d   :  { %1687 = vpow2.f32 %v1437_v52 }
 0x84e   :  { %1689 = vtanh.f32 %v1302_v9 }
 0x84f   :  { %1691 = vpow2.f32 %v1435_v53 }
 0x850   :  { %1693 = vpow2.f32 %v1438_v56 }
 0x854   :  { %v1682_v57 = vpop.eup %1681 }
 0x855   :  { %v1325_v61 = vadd.f32 1.0, %v1682_v57  ;;  %v1684_v31 = vpop.eup %1683 }
 0x856   :  { %v1686_v32 = vpop.eup %1685  ;;  %v1326_v58 = vadd.f32 1.0, %v1684_v31 }
 0x857   :  { %1695 = vrcp.f32 %v1325_v61  ;;  %v1328_v62 = vadd.f32 1.0, %v1686_v32  ;;  %v1688_v63 = vpop.eup %1687 }
 0x858   :  { %1697 = vtanh.f32 %v1306_v30  ;;  %v1329_v34 = vadd.f32 1.0, %v1688_v63  ;;  %v1690_v35 = vpop.eup %1689 }
 0x859   :  { %1699 = vrcp.f32 %v1326_v58  ;;  %v1692_v37 = vpop.eup %1691 }
 0x85a   :  { %1701 = vrcp.f32 %v1328_v62  ;;  %v1694_v38 = vpop.eup %1693  ;;  %v1327_v42 = vadd.f32 1.0, %v1692_v37 }
 0x85b   :  { %1703 = vrcp.f32 %v1329_v34  ;;  %v1330_v41 = vadd.f32 1.0, %v1694_v38 }
 0x85c   :  { %1705 = vrcp.f32 %v1327_v42 }
 0x861   :  { %v1696_v40 = vpop.eup %1695 }
 0x862   :  { %v1698_v54 = vpop.eup %1697  ;;  %v1347_v59 = vmul.f32 %v1696_v40, %v1690_v35 }
 0x863   :  { %v1700_v55 = vpop.eup %1699 }
 0x864   :  { %v1702_v60 = vpop.eup %1701  ;;  %v1345_v39 = vmul.f32 %v1700_v55, %v2289_v2 }
 0x865   :  { %v1348_v50 = vmul.f32 %v1702_v60, %v1698_v54  ;;  %v1704_v6 = vpop.eup %1703 }
 0x866   :  { %v1349_v33 = vadd.f32 %v1347_v59, %v1345_v39  ;;  %v1346_v44 = vmul.f32 %v1704_v6, %v2293_v7  ;;  %v1706_v51 = vpop.eup %1705 }
 0x868   :  { %1707 = vtanh.f32 %v1349_v33  ;;  %v1350_v29 = vadd.f32 %v1348_v50, %v1346_v44 }
 0x869   :  { %1709 = vrcp.f32 %v1330_v41 }
 0x86a   :  { %1711 = vtanh.f32 %v1350_v29 }
 0x872   :  { %v1708_v47 = vpop.eup %1707 }
 0x873   :  { %v1353_v3 = vmul.f32 %v1708_v47, %v1706_v51  ;;  %v1710_v10 = vpop.eup %1709 }
 0x874   :  { %v1712_v43 = vpop.eup %1711 }
 0x875   :  { %1364 = vst [vmem:[#allocation9] sm:$0xff] %v1353_v3  ;;  %v1354_v2 = vmul.f32 %v1712_v43, %v1710_v10 }
 0x877   :  { %1365 = vst [vmem:[#allocation9 + $0x8] sm:$0xff] %v1354_v2 }
 0x878   :  { %1778 = shalt.err (!%p1775_p12)
}
 0x879   :  { %s1779_s13 = scalar_lea.hbm %s2312_s2, 256 }
 0x87a   :  { %p1780_p13 = scmp.ne.s32.totalorder %s2312_s2, %s1779_s13  ;;  %p1783_p0 = scmp.lt.u32.totalorder %s1779_s13, %s2312_s2 }
 0x87c   :  { %p1785_p1 = pnand %p1783_p0, %p1780_p13 }
 0x87e   :  { %1788 = shalt.err (!%p1785_p1)
}
 0x87f   :  { %s1810_s18 = smov 128   ;;  %s1811_s19 = smov 8  }
 0x880   :  { %1377 = dma.vmem_to_hbm [thread:$0]  %s1372_s9, 256, %s2312_s2, [#allocation8], %s1810_s18, %s1810_s18, %s1811_s19  }
 0x881   :  { %1793 = dma.done.wait [#allocation8], 256  }
 0x882   :  { %1794 = vsyncadd [#allocation8], 4294967040 }
 0x883   :  { %1381 = vsyncpa [#allocation7], 1 }
 0x884   :  { %1382 = vsyncpa [#allocation8], 1 }
 0x885   :  { %1383 = vsyncmov [#allocation5] }
 0x888   :  { %s1384_s22 = vpop.sfrf %1383 }
 0x889   :  { %p1439_p2 = scmp.ne.s32.totalorder %s1384_s22, 0 }
 0x88b   :  { %1388 = shalt.err (%p1439_p2)  }

</bundles_post_ra>
